<compile_context>
chip_gen: v6e
topology: v6e:2x2x1
jax: 0.10.0
libtpu: 0.0.40
codegen_flags: <defaults>
</compile_context>

<pallas_src>
import jax
import jax.numpy as jnp
from jax.experimental import pallas as pl
from jax.experimental.pallas import tpu as pltpu


# --------------------------------------------------------------------------------------
# In-kernel helpers (traced inline).
# --------------------------------------------------------------------------------------
def _stage_planes(x_f32, c_stg, l_stg, r_stg):
    """Build the three W-shift planes of the conv input, with a zero H-halo.

    x_f32 : (Bt, H, W, C) f32 value (conv input for this batch block)
    c_stg : (Bt, H+2, W, C) bf16 ref    c_stg[b, h+1, w] = x[b, h, w]
    l_stg : (Bt, H+2, W, C) bf16 ref    l_stg[b, h+1, w] = x[b, h, w-1]  (0 at w == 0)
    r_stg : (Bt, H+2, W, C) bf16 ref    r_stg[b, h+1, w] = x[b, h, w+1]  (0 at w == W-1)

    Rows 0 and H+1 are the zero H-halo.  Rolls are done in f32 (native (8,128) tiling);
    the wrapped edge column of each rolled plane is zeroed with one small column store
    per batch block.  No element of the scratch is left stale.
    """
    Bt, H, W, C = x_f32.shape
    dt = c_stg.dtype
    zrow = jnp.zeros((Bt, 1, W, C), dt)
    zcol = jnp.zeros((Bt, H + 2, 1, C), dt)
    for stg in (c_stg, l_stg, r_stg):
        stg[:, 0:1, :, :] = zrow
        stg[:, H + 1:H + 2, :, :] = zrow
    c_stg[:, 1:H + 1, :, :] = x_f32.astype(dt)
    # roll(shift=1):   out[w] = x[w-1]  (wraps at w=0 -> zeroed column 0)
    # roll(shift=W-1): out[w] = x[w+1]  (wraps at w=W-1 -> zeroed column W-1)
    l_stg[:, 1:H + 1, :, :] = pltpu.roll(x_f32, shift=1, axis=2).astype(dt)
    l_stg[:, :, 0:1, :] = zcol
    r_stg[:, 1:H + 1, :, :] = pltpu.roll(x_f32, shift=W - 1, axis=2).astype(dt)
    r_stg[:, :, W - 1:W, :] = zcol


def _conv3x3_chunk(planes, w_ref, b0, ipc):
    """9-tap 3x3 conv for images [b0, b0+ipc) of the batch block, one Cout tile.

    planes : (left, center, right) staging refs, each (Bt, H+2, W, C) bf16
    w_ref  : (9, C, Co_t) bf16, tap k = kh*3 + kw (PyTorch cross-correlation order)
    Returns the (ipc*H*W, Co_t) f32 pre-bias accumulator.  Tap k=0 initialises it, so
    all nine MXU results accumulate into one chunk-sized value before any epilogue.
    """
    Bt, Hp2, W, C = planes[1].shape
    H = Hp2 - 2
    Mc = ipc * H * W
    acc = None
    for kh in range(3):
        for kw in range(3):
            # output (h, w), tap (kh, kw) reads input (h+kh-1, w+kw-1):
            #   H shift -> row slice kh:kh+H of the zero-H-halo buffer (aligned)
            #   W shift -> plane choice: kw==0 left (x[w-1]), 1 center, 2 right (x[w+1])
            opnd = planes[kw][b0:b0 + ipc, kh:kh + H, :, :].reshape(Mc, C)
            term = jnp.dot(opnd, w_ref[kh * 3 + kw],
                           preferred_element_type=jnp.float32)
            acc = term if acc is None else acc + term
    return acc


def _images_per_chunk(bt, h, w):
    """Images folded into one MXU matmul chunk: fill >=256 rows, divide the batch block."""
    ipc = min(bt, max(1, -(-256 // (h * w))))
    while bt % ipc:
        ipc -= 1
    return max(ipc, 1)


# --------------------------------------------------------------------------------------
# Kernels.
# --------------------------------------------------------------------------------------
def _conv_relu_kernel(x_ref, w_ref, b_ref, y_ref, c_stg, l_stg, r_stg):
    """y = relu(conv3x3(x) + bias), bf16, for one (batch block, cout tile) grid step."""
    Bt, H, W, _ = x_ref.shape
    Co = w_ref.shape[2]
    ipc = _images_per_chunk(Bt, H, W)

    # Stage the three shift planes once per batch block; the cout axis is innermost and
    # "arbitrary", so every core sees co == 0 first for each of its batch blocks.
    @pl.when(pl.program_id(1) == 0)
    def _():
        _stage_planes(x_ref[...].astype(jnp.float32), c_stg, l_stg, r_stg)

    planes = (l_stg, c_stg, r_stg)
    bias = b_ref[...].astype(jnp.float32)                        # (1, Co)
    for b0 in range(0, Bt, ipc):                                 # fused per-chunk epilogue
        acc = _conv3x3_chunk(planes, w_ref, b0, ipc) + bias      # (ipc*H*W, Co) f32
        y = jnp.maximum(acc, 0.0).astype(y_ref.dtype)
        y_ref[b0:b0 + ipc, :, :, :] = y.reshape(ipc, H, W, Co)


def _conv_residual_kernel(y_ref, xres_ref, w_ref, b_ref, out_ref, c_stg, l_stg, r_stg):
    """noise = conv3x3(y1) + bias; out = x - noise, for one (batch block, cout tile)."""
    Bt, H, W, _ = y_ref.shape
    Co = w_ref.shape[2]
    ipc = _images_per_chunk(Bt, H, W)

    @pl.when(pl.program_id(1) == 0)
    def _():
        _stage_planes(y_ref[...].astype(jnp.float32), c_stg, l_stg, r_stg)

    planes = (l_stg, c_stg, r_stg)
    bias = b_ref[...].astype(jnp.float32)                        # (1, Co)
    for b0 in range(0, Bt, ipc):
        noise = _conv3x3_chunk(planes, w_ref, b0, ipc) + bias    # (ipc*H*W, Co) f32
        xs = xres_ref[b0:b0 + ipc, :, :, :].astype(jnp.float32).reshape(ipc * H * W, Co)
        out = (xs - noise).reshape(ipc, H, W, Co).astype(out_ref.dtype)
        out_ref[b0:b0 + ipc, :, :, :] = out


# --------------------------------------------------------------------------------------
# Wrapper.
# --------------------------------------------------------------------------------------
def _choose_block_b(B, H, W):
    """Images per grid step: target >=256 MXU rows but keep >=2 batch grid steps when the
    batch allows it (megacore sharding of the 'parallel' batch axis)."""
    bb = min(B, max(1, -(-256 // (H * W))))
    if B >= 2:
        bb = min(bb, max(1, B // 2))
    while B % bb:
        bb -= 1
    return max(bb, 1)


def _choose_cout_tile(C):
    """Cout tile of ~256 lanes: the (9, C, ct) bf16 weight slab stays a few MB at C=1280."""
    for ct in (256, 128):
        if C % ct == 0:
            return ct
    return C


def _vmem_limit_bytes(frac=0.85, fallback=64 << 20):
    """Scoped-VMEM limit from the actual chip (v5e/v6e: 128 MiB, v7x: 64 MiB per TC)."""
    cap = fallback
    if hasattr(pltpu, "get_tpu_info"):
        try:
            cap = int(pltpu.get_tpu_info().vmem_capacity_bytes)
        except Exception:  # hardware query only — never changes kernel semantics
            cap = fallback
    return max(32 << 20, int(frac * cap))


def simple_dae_denoise(x_nchw, w1, b1, w2, b2, *, block_b=None, cout_tile=None):
    """x_nchw: (B, C, H, W) backbone features (PyTorch layout); conv weights in PyTorch
    layout (Cout, Cin, 3, 3), biases (C,).  Returns x - noise_prediction(x) in NCHW."""
    B, C, H, W = x_nchw.shape
    x = jnp.transpose(x_nchw, (0, 2, 3, 1))                      # NHWC

    def reorg(w):   # (Cout, Cin, 3, 3) -> (kh*3+kw, Cin, Cout), bf16 for the MXU
        return jnp.transpose(w, (2, 3, 1, 0)).reshape(9, C, C).astype(jnp.bfloat16)

    w1r, w2r = reorg(w1), reorg(w2)
    b1r = b1.reshape(1, C).astype(jnp.float32)
    b2r = b2.reshape(1, C).astype(jnp.float32)

    if block_b is None:
        block_b = _choose_block_b(B, H, W)
    if cout_tile is None:
        cout_tile = _choose_cout_tile(C)
    assert B % block_b == 0 and C % cout_tile == 0
    nb, nco = B // block_b, C // cout_tile
    grid = (nb, nco)

    cparams = pltpu.CompilerParams(
        dimension_semantics=("parallel", "arbitrary"),   # cout inner: staging reused per b
        vmem_limit_bytes=_vmem_limit_bytes())

    stage_scratch = [pltpu.VMEM((block_b, H + 2, W, C), jnp.bfloat16)] * 3

    conv_flops = 2 * 9 * B * H * W * C * C
    bytes_x = B * H * W * C * 4
    bytes_y = B * H * W * C * 2
    bytes_w = nb * 9 * C * C * 2 + C * 4      # weight slabs re-read once per batch block

    full_spec = pl.BlockSpec((block_b, H, W, C), lambda b, co: (b, 0, 0, 0))
    tile_spec = pl.BlockSpec((block_b, H, W, cout_tile), lambda b, co: (b, 0, 0, co))
    w_spec = pl.BlockSpec((9, C, cout_tile), lambda b, co: (0, 0, co))
    bias_spec = pl.BlockSpec((1, cout_tile), lambda b, co: (0, co))

    # ---- conv1 + bias + ReLU -> bf16 y1 ------------------------------------------------
    y1 = pl.pallas_call(
        _conv_relu_kernel,
        out_shape=jax.ShapeDtypeStruct((B, H, W, C), jnp.bfloat16),
        grid_spec=pltpu.PrefetchScalarGridSpec(
            num_scalar_prefetch=0, grid=grid,
            in_specs=[full_spec, w_spec, bias_spec],
            out_specs=tile_spec,
            scratch_shapes=stage_scratch),
        compiler_params=cparams,
        cost_estimate=pl.CostEstimate(flops=conv_flops, transcendentals=0,
                                      bytes_accessed=bytes_x + bytes_w + bytes_y),
    )(x, w1r, b1r)

    # ---- conv2 + bias, residual subtract -----------------------------------------------
    out_nhwc = pl.pallas_call(
        _conv_residual_kernel,
        out_shape=jax.ShapeDtypeStruct((B, H, W, C), x.dtype),
        grid_spec=pltpu.PrefetchScalarGridSpec(
            num_scalar_prefetch=0, grid=grid,
            in_specs=[full_spec, tile_spec, w_spec, bias_spec],
            out_specs=tile_spec,
            scratch_shapes=stage_scratch),
        compiler_params=cparams,
        cost_estimate=pl.CostEstimate(flops=conv_flops, transcendentals=0,
                                      bytes_accessed=bytes_y + 2 * bytes_x + bytes_w),
    )(y1, x, w2r, b2r)

    return jnp.transpose(out_nhwc, (0, 3, 1, 2))                 # back to NCHW


# ---- pure-JAX reference with matching numerics (bf16 operands, f32 accumulation) ------
def _ref_conv(x_nhwc, w, b):
    w_hwio = jnp.transpose(w, (2, 3, 1, 0)).astype(jnp.bfloat16)
    y = jax.lax.conv_general_dilated(
        x_nhwc.astype(jnp.bfloat16), w_hwio, window_strides=(1, 1), padding="SAME",
        dimension_numbers=("NHWC", "HWIO", "NHWC"),
        preferred_element_type=jnp.float32)
    return y + b[None, None, None, :].astype(jnp.float32)


def _reference(x_nchw, w1, b1, w2, b2):
    x = jnp.transpose(x_nchw, (0, 2, 3, 1)).astype(jnp.float32)
    y1 = jax.nn.relu(_ref_conv(x, w1, b1))
    noise = _ref_conv(y1, w2, b2)
    return jnp.transpose(x - noise, (0, 3, 1, 2))


if __name__ == "__main__":
    # Small, module-consistent shapes: C=128 stands in for the real 1280 channels,
    # spatial 8x8 feature map, batch 2.
    B, C, H, W = 2, 128, 8, 8

    key = jax.random.PRNGKey(0)
    kx, kw1, kb1, kw2, kb2 = jax.random.split(key, 5)
    x = jax.random.normal(kx, (B, C, H, W), jnp.float32)
    w1 = jax.random.normal(kw1, (C, C, 3, 3), jnp.float32) * 0.02
    b1 = jax.random.normal(kb1, (C,), jnp.float32) * 0.02
    w2 = jax.random.normal(kw2, (C, C, 3, 3), jnp.float32) * 0.02
    b2 = jax.random.normal(kb2, (C,), jnp.float32) * 0.02

    out = jax.block_until_ready(simple_dae_denoise(x, w1, b1, w2, b2))
    ref = jax.block_until_ready(_reference(x, w1, b1, w2, b2))

    assert out.shape == (B, C, H, W)
    assert jnp.allclose(out, ref, atol=1e-2, rtol=1e-2), "mismatch vs JAX reference"

    print("KERNEL_OK")
</pallas_src>

<mosaic_0001>
module attributes {stable_mosaic.version = 11 : i64} {
  func.func @_conv_relu_kernel(%arg0: i32, %arg1: i32, %arg2: memref<1x8x8x128xf32, #tpu.memory_space<vmem>>, %arg3: memref<9x128x128xbf16, #tpu.memory_space<vmem>>, %arg4: memref<1x128xf32, #tpu.memory_space<vmem>>, %arg5: memref<1x8x8x128xbf16, #tpu.memory_space<vmem>>, %arg6: memref<1x10x8x128xbf16, #tpu.memory_space<vmem>>, %arg7: memref<1x10x8x128xbf16, #tpu.memory_space<vmem>>, %arg8: memref<1x10x8x128xbf16, #tpu.memory_space<vmem>>) attributes {dimension_semantics = [#tpu.dimension_semantics<parallel>, #tpu.dimension_semantics<arbitrary>], iteration_bounds = array<i64: 2, 1>, scalar_prefetch = 0 : i64, scratch_operands = 3 : i64, tpu.core_type = #tpu.core_type<tc>, window_params = [{transform_indices = @transform_0, window_bounds = array<i64: 1, 8, 8, 128>}, {transform_indices = @transform_1, window_bounds = array<i64: 9, 128, 128>}, {transform_indices = @transform_2, window_bounds = array<i64: 1, 128>}, {transform_indices = @transform_3, window_bounds = array<i64: 1, 8, 8, 128>}]} {
    %c0_i32 = arith.constant 0 : i32
    %0 = arith.cmpi eq, %arg1, %c0_i32 : i32
    %1 = arith.extui %0 : i1 to i32
    %c0_i32_0 = arith.constant 0 : i32
    %2 = arith.cmpi ne, %1, %c0_i32_0 : i32
    scf.if %2 {
      %c0_70 = arith.constant 0 : index
      %c0_71 = arith.constant 0 : index
      %c0_72 = arith.constant 0 : index
      %c0_73 = arith.constant 0 : index
      %64 = vector.load %arg2[%c0_70, %c0_71, %c0_72, %c0_73] : memref<1x8x8x128xf32, #tpu.memory_space<vmem>>, vector<1x8x8x128xf32>
      %cst_74 = arith.constant 0.000000e+00 : bf16
      %65 = vector.broadcast %cst_74 : bf16 to vector<1x1x8x128xbf16>
      %cst_75 = arith.constant 0.000000e+00 : bf16
      %66 = vector.broadcast %cst_75 : bf16 to vector<1x10x1x128xbf16>
      %c0_76 = arith.constant 0 : index
      %c0_77 = arith.constant 0 : index
      %c0_78 = arith.constant 0 : index
      %c0_79 = arith.constant 0 : index
      %67 = vector.load %arg6[%c0_76, %c0_77, %c0_78, %c0_79] : memref<1x10x8x128xbf16, #tpu.memory_space<vmem>>, vector<1x1x8x128xbf16>
      tpu.vector_store %arg6[%c0_76, %c0_77, %c0_78, %c0_79], %65 {strides = array<i32>} : memref<1x10x8x128xbf16, #tpu.memory_space<vmem>>, vector<1x1x8x128xbf16>,
      %c0_80 = arith.constant 0 : index
      %c9 = arith.constant 9 : index
      %c0_81 = arith.constant 0 : index
      %c0_82 = arith.constant 0 : index
      %68 = vector.load %arg6[%c0_80, %c9, %c0_81, %c0_82] : memref<1x10x8x128xbf16, #tpu.memory_space<vmem>>, vector<1x1x8x128xbf16>
      tpu.vector_store %arg6[%c0_80, %c9, %c0_81, %c0_82], %65 {strides = array<i32>} : memref<1x10x8x128xbf16, #tpu.memory_space<vmem>>, vector<1x1x8x128xbf16>,
      %c0_83 = arith.constant 0 : index
      %c0_84 = arith.constant 0 : index
      %c0_85 = arith.constant 0 : index
      %c0_86 = arith.constant 0 : index
      %69 = vector.load %arg7[%c0_83, %c0_84, %c0_85, %c0_86] : memref<1x10x8x128xbf16, #tpu.memory_space<vmem>>, vector<1x1x8x128xbf16>
      tpu.vector_store %arg7[%c0_83, %c0_84, %c0_85, %c0_86], %65 {strides = array<i32>} : memref<1x10x8x128xbf16, #tpu.memory_space<vmem>>, vector<1x1x8x128xbf16>,
      %c0_87 = arith.constant 0 : index
      %c9_88 = arith.constant 9 : index
      %c0_89 = arith.constant 0 : index
      %c0_90 = arith.constant 0 : index
      %70 = vector.load %arg7[%c0_87, %c9_88, %c0_89, %c0_90] : memref<1x10x8x128xbf16, #tpu.memory_space<vmem>>, vector<1x1x8x128xbf16>
      tpu.vector_store %arg7[%c0_87, %c9_88, %c0_89, %c0_90], %65 {strides = array<i32>} : memref<1x10x8x128xbf16, #tpu.memory_space<vmem>>, vector<1x1x8x128xbf16>,
      %c0_91 = arith.constant 0 : index
      %c0_92 = arith.constant 0 : index
      %c0_93 = arith.constant 0 : index
      %c0_94 = arith.constant 0 : index
      %71 = vector.load %arg8[%c0_91, %c0_92, %c0_93, %c0_94] : memref<1x10x8x128xbf16, #tpu.memory_space<vmem>>, vector<1x1x8x128xbf16>
      tpu.vector_store %arg8[%c0_91, %c0_92, %c0_93, %c0_94], %65 {strides = array<i32>} : memref<1x10x8x128xbf16, #tpu.memory_space<vmem>>, vector<1x1x8x128xbf16>,
      %c0_95 = arith.constant 0 : index
      %c9_96 = arith.constant 9 : index
      %c0_97 = arith.constant 0 : index
      %c0_98 = arith.constant 0 : index
      %72 = vector.load %arg8[%c0_95, %c9_96, %c0_97, %c0_98] : memref<1x10x8x128xbf16, #tpu.memory_space<vmem>>, vector<1x1x8x128xbf16>
      tpu.vector_store %arg8[%c0_95, %c9_96, %c0_97, %c0_98], %65 {strides = array<i32>} : memref<1x10x8x128xbf16, #tpu.memory_space<vmem>>, vector<1x1x8x128xbf16>,
      %73 = arith.truncf %64 : vector<1x8x8x128xf32> to vector<1x8x8x128xbf16>
      %c0_99 = arith.constant 0 : index
      %c1_100 = arith.constant 1 : index
      %c0_101 = arith.constant 0 : index
      %c0_102 = arith.constant 0 : index
      %74 = vector.load %arg6[%c0_99, %c1_100, %c0_101, %c0_102] : memref<1x10x8x128xbf16, #tpu.memory_space<vmem>>, vector<1x8x8x128xbf16>
      tpu.vector_store %arg6[%c0_99, %c1_100, %c0_101, %c0_102], %73 {strides = array<i32>} : memref<1x10x8x128xbf16, #tpu.memory_space<vmem>>, vector<1x8x8x128xbf16>,
      %c1_i32 = arith.constant 1 : i32
      %75 = tpu.dynamic_rotate %64 by %c1_i32 dim 2 : vector<1x8x8x128xf32>, i32 -> vector<1x8x8x128xf32>
      %76 = arith.truncf %75 : vector<1x8x8x128xf32> to vector<1x8x8x128xbf16>
      %c0_103 = arith.constant 0 : index
      %c1_104 = arith.constant 1 : index
      %c0_105 = arith.constant 0 : index
      %c0_106 = arith.constant 0 : index
      %77 = vector.load %arg7[%c0_103, %c1_104, %c0_105, %c0_106] : memref<1x10x8x128xbf16, #tpu.memory_space<vmem>>, vector<1x8x8x128xbf16>
      tpu.vector_store %arg7[%c0_103, %c1_104, %c0_105, %c0_106], %76 {strides = array<i32>} : memref<1x10x8x128xbf16, #tpu.memory_space<vmem>>, vector<1x8x8x128xbf16>,
      %c0_107 = arith.constant 0 : index
      %c0_108 = arith.constant 0 : index
      %c0_109 = arith.constant 0 : index
      %c0_110 = arith.constant 0 : index
      %78 = vector.load %arg7[%c0_107, %c0_108, %c0_109, %c0_110] : memref<1x10x8x128xbf16, #tpu.memory_space<vmem>>, vector<1x10x1x128xbf16>
      tpu.vector_store %arg7[%c0_107, %c0_108, %c0_109, %c0_110], %66 {strides = array<i32>} : memref<1x10x8x128xbf16, #tpu.memory_space<vmem>>, vector<1x10x1x128xbf16>,
      %c7_i32 = arith.constant 7 : i32
      %79 = tpu.dynamic_rotate %64 by %c7_i32 dim 2 : vector<1x8x8x128xf32>, i32 -> vector<1x8x8x128xf32>
      %80 = arith.truncf %79 : vector<1x8x8x128xf32> to vector<1x8x8x128xbf16>
      %c0_111 = arith.constant 0 : index
      %c1_112 = arith.constant 1 : index
      %c0_113 = arith.constant 0 : index
      %c0_114 = arith.constant 0 : index
      %81 = vector.load %arg8[%c0_111, %c1_112, %c0_113, %c0_114] : memref<1x10x8x128xbf16, #tpu.memory_space<vmem>>, vector<1x8x8x128xbf16>
      tpu.vector_store %arg8[%c0_111, %c1_112, %c0_113, %c0_114], %80 {strides = array<i32>} : memref<1x10x8x128xbf16, #tpu.memory_space<vmem>>, vector<1x8x8x128xbf16>,
      %c0_115 = arith.constant 0 : index
      %c0_116 = arith.constant 0 : index
      %c7_117 = arith.constant 7 : index
      %c0_118 = arith.constant 0 : index
      %82 = vector.load %arg8[%c0_115, %c0_116, %c7_117, %c0_118] : memref<1x10x8x128xbf16, #tpu.memory_space<vmem>>, vector<1x10x1x128xbf16>
      tpu.vector_store %arg8[%c0_115, %c0_116, %c7_117, %c0_118], %66 {strides = array<i32>} : memref<1x10x8x128xbf16, #tpu.memory_space<vmem>>, vector<1x10x1x128xbf16>,
    } else {
    }
    %c0 = arith.constant 0 : index
    %c0_1 = arith.constant 0 : index
    %3 = vector.load %arg4[%c0, %c0_1] : memref<1x128xf32, #tpu.memory_space<vmem>>, vector<1x128xf32>
    %c0_2 = arith.constant 0 : index
    %c0_3 = arith.constant 0 : index
    %c0_4 = arith.constant 0 : index
    %c0_5 = arith.constant 0 : index
    %4 = vector.load %arg7[%c0_2, %c0_3, %c0_4, %c0_5] : memref<1x10x8x128xbf16, #tpu.memory_space<vmem>>, vector<1x8x8x128xbf16>
    %5 = vector.shape_cast %4 : vector<1x8x8x128xbf16> to vector<64x128xbf16>
    %c0_6 = arith.constant 0 : index
    %c0_7 = arith.constant 0 : index
    %c0_8 = arith.constant 0 : index
    %6 = vector.load %arg3[%c0_6, %c0_7, %c0_8] : memref<9x128x128xbf16, #tpu.memory_space<vmem>>, vector<1x128x128xbf16>
    %7 = vector.shape_cast %6 : vector<1x128x128xbf16> to vector<128x128xbf16>
    %cst = arith.constant dense<0.000000e+00> : vector<64x128xf32>
    %8 = tpu.matmul %5, %7, %cst {dimension_numbers = #tpu.dot_dimension_numbers<[1], [0], [0], [1], [0, 0, 1, 1], [], []>} : vector<64x128xbf16>, vector<128x128xbf16>, vector<64x128xf32> -> vector<64x128xf32>
    %c0_9 = arith.constant 0 : index
    %c0_10 = arith.constant 0 : index
    %c0_11 = arith.constant 0 : index
    %c0_12 = arith.constant 0 : index
    %9 = vector.load %arg6[%c0_9, %c0_10, %c0_11, %c0_12] : memref<1x10x8x128xbf16, #tpu.memory_space<vmem>>, vector<1x8x8x128xbf16>
    %10 = vector.shape_cast %9 : vector<1x8x8x128xbf16> to vector<64x128xbf16>
    %c1 = arith.constant 1 : index
    %c0_13 = arith.constant 0 : index
    %c0_14 = arith.constant 0 : index
    %11 = vector.load %arg3[%c1, %c0_13, %c0_14] : memref<9x128x128xbf16, #tpu.memory_space<vmem>>, vector<1x128x128xbf16>
    %12 = vector.shape_cast %11 : vector<1x128x128xbf16> to vector<128x128xbf16>
    %cst_15 = arith.constant dense<0.000000e+00> : vector<64x128xf32>
    %13 = tpu.matmul %10, %12, %cst_15 {dimension_numbers = #tpu.dot_dimension_numbers<[1], [0], [0], [1], [0, 0, 1, 1], [], []>} : vector<64x128xbf16>, vector<128x128xbf16>, vector<64x128xf32> -> vector<64x128xf32>
    %14 = arith.addf %8, %13 : vector<64x128xf32>
    %c0_16 = arith.constant 0 : index
    %c0_17 = arith.constant 0 : index
    %c0_18 = arith.constant 0 : index
    %c0_19 = arith.constant 0 : index
    %15 = vector.load %arg8[%c0_16, %c0_17, %c0_18, %c0_19] : memref<1x10x8x128xbf16, #tpu.memory_space<vmem>>, vector<1x8x8x128xbf16>
    %16 = vector.shape_cast %15 : vector<1x8x8x128xbf16> to vector<64x128xbf16>
    %c2 = arith.constant 2 : index
    %c0_20 = arith.constant 0 : index
    %c0_21 = arith.constant 0 : index
    %17 = vector.load %arg3[%c2, %c0_20, %c0_21] : memref<9x128x128xbf16, #tpu.memory_space<vmem>>, vector<1x128x128xbf16>
    %18 = vector.shape_cast %17 : vector<1x128x128xbf16> to vector<128x128xbf16>
    %cst_22 = arith.constant dense<0.000000e+00> : vector<64x128xf32>
    %19 = tpu.matmul %16, %18, %cst_22 {dimension_numbers = #tpu.dot_dimension_numbers<[1], [0], [0], [1], [0, 0, 1, 1], [], []>} : vector<64x128xbf16>, vector<128x128xbf16>, vector<64x128xf32> -> vector<64x128xf32>
    %20 = arith.addf %14, %19 : vector<64x128xf32>
    %c0_23 = arith.constant 0 : index
    %c1_24 = arith.constant 1 : index
    %c0_25 = arith.constant 0 : index
    %c0_26 = arith.constant 0 : index
    %21 = vector.load %arg7[%c0_23, %c1_24, %c0_25, %c0_26] : memref<1x10x8x128xbf16, #tpu.memory_space<vmem>>, vector<1x8x8x128xbf16>
    %22 = vector.shape_cast %21 : vector<1x8x8x128xbf16> to vector<64x128xbf16>
    %c3 = arith.constant 3 : index
    %c0_27 = arith.constant 0 : index
    %c0_28 = arith.constant 0 : index
    %23 = vector.load %arg3[%c3, %c0_27, %c0_28] : memref<9x128x128xbf16, #tpu.memory_space<vmem>>, vector<1x128x128xbf16>
    %24 = vector.shape_cast %23 : vector<1x128x128xbf16> to vector<128x128xbf16>
    %cst_29 = arith.constant dense<0.000000e+00> : vector<64x128xf32>
    %25 = tpu.matmul %22, %24, %cst_29 {dimension_numbers = #tpu.dot_dimension_numbers<[1], [0], [0], [1], [0, 0, 1, 1], [], []>} : vector<64x128xbf16>, vector<128x128xbf16>, vector<64x128xf32> -> vector<64x128xf32>
    %26 = arith.addf %20, %25 : vector<64x128xf32>
    %c0_30 = arith.constant 0 : index
    %c1_31 = arith.constant 1 : index
    %c0_32 = arith.constant 0 : index
    %c0_33 = arith.constant 0 : index
    %27 = vector.load %arg6[%c0_30, %c1_31, %c0_32, %c0_33] : memref<1x10x8x128xbf16, #tpu.memory_space<vmem>>, vector<1x8x8x128xbf16>
    %28 = vector.shape_cast %27 : vector<1x8x8x128xbf16> to vector<64x128xbf16>
    %c4 = arith.constant 4 : index
    %c0_34 = arith.constant 0 : index
    %c0_35 = arith.constant 0 : index
    %29 = vector.load %arg3[%c4, %c0_34, %c0_35] : memref<9x128x128xbf16, #tpu.memory_space<vmem>>, vector<1x128x128xbf16>
    %30 = vector.shape_cast %29 : vector<1x128x128xbf16> to vector<128x128xbf16>
    %cst_36 = arith.constant dense<0.000000e+00> : vector<64x128xf32>
    %31 = tpu.matmul %28, %30, %cst_36 {dimension_numbers = #tpu.dot_dimension_numbers<[1], [0], [0], [1], [0, 0, 1, 1], [], []>} : vector<64x128xbf16>, vector<128x128xbf16>, vector<64x128xf32> -> vector<64x128xf32>
    %32 = arith.addf %26, %31 : vector<64x128xf32>
    %c0_37 = arith.constant 0 : index
    %c1_38 = arith.constant 1 : index
    %c0_39 = arith.constant 0 : index
    %c0_40 = arith.constant 0 : index
    %33 = vector.load %arg8[%c0_37, %c1_38, %c0_39, %c0_40] : memref<1x10x8x128xbf16, #tpu.memory_space<vmem>>, vector<1x8x8x128xbf16>
    %34 = vector.shape_cast %33 : vector<1x8x8x128xbf16> to vector<64x128xbf16>
    %c5 = arith.constant 5 : index
    %c0_41 = arith.constant 0 : index
    %c0_42 = arith.constant 0 : index
    %35 = vector.load %arg3[%c5, %c0_41, %c0_42] : memref<9x128x128xbf16, #tpu.memory_space<vmem>>, vector<1x128x128xbf16>
    %36 = vector.shape_cast %35 : vector<1x128x128xbf16> to vector<128x128xbf16>
    %cst_43 = arith.constant dense<0.000000e+00> : vector<64x128xf32>
    %37 = tpu.matmul %34, %36, %cst_43 {dimension_numbers = #tpu.dot_dimension_numbers<[1], [0], [0], [1], [0, 0, 1, 1], [], []>} : vector<64x128xbf16>, vector<128x128xbf16>, vector<64x128xf32> -> vector<64x128xf32>
    %38 = arith.addf %32, %37 : vector<64x128xf32>
    %c0_44 = arith.constant 0 : index
    %c2_45 = arith.constant 2 : index
    %c0_46 = arith.constant 0 : index
    %c0_47 = arith.constant 0 : index
    %39 = vector.load %arg7[%c0_44, %c2_45, %c0_46, %c0_47] : memref<1x10x8x128xbf16, #tpu.memory_space<vmem>>, vector<1x8x8x128xbf16>
    %40 = vector.shape_cast %39 : vector<1x8x8x128xbf16> to vector<64x128xbf16>
    %c6 = arith.constant 6 : index
    %c0_48 = arith.constant 0 : index
    %c0_49 = arith.constant 0 : index
    %41 = vector.load %arg3[%c6, %c0_48, %c0_49] : memref<9x128x128xbf16, #tpu.memory_space<vmem>>, vector<1x128x128xbf16>
    %42 = vector.shape_cast %41 : vector<1x128x128xbf16> to vector<128x128xbf16>
    %cst_50 = arith.constant dense<0.000000e+00> : vector<64x128xf32>
    %43 = tpu.matmul %40, %42, %cst_50 {dimension_numbers = #tpu.dot_dimension_numbers<[1], [0], [0], [1], [0, 0, 1, 1], [], []>} : vector<64x128xbf16>, vector<128x128xbf16>, vector<64x128xf32> -> vector<64x128xf32>
    %44 = arith.addf %38, %43 : vector<64x128xf32>
    %c0_51 = arith.constant 0 : index
    %c2_52 = arith.constant 2 : index
    %c0_53 = arith.constant 0 : index
    %c0_54 = arith.constant 0 : index
    %45 = vector.load %arg6[%c0_51, %c2_52, %c0_53, %c0_54] : memref<1x10x8x128xbf16, #tpu.memory_space<vmem>>, vector<1x8x8x128xbf16>
    %46 = vector.shape_cast %45 : vector<1x8x8x128xbf16> to vector<64x128xbf16>
    %c7 = arith.constant 7 : index
    %c0_55 = arith.constant 0 : index
    %c0_56 = arith.constant 0 : index
    %47 = vector.load %arg3[%c7, %c0_55, %c0_56] : memref<9x128x128xbf16, #tpu.memory_space<vmem>>, vector<1x128x128xbf16>
    %48 = vector.shape_cast %47 : vector<1x128x128xbf16> to vector<128x128xbf16>
    %cst_57 = arith.constant dense<0.000000e+00> : vector<64x128xf32>
    %49 = tpu.matmul %46, %48, %cst_57 {dimension_numbers = #tpu.dot_dimension_numbers<[1], [0], [0], [1], [0, 0, 1, 1], [], []>} : vector<64x128xbf16>, vector<128x128xbf16>, vector<64x128xf32> -> vector<64x128xf32>
    %50 = arith.addf %44, %49 : vector<64x128xf32>
    %c0_58 = arith.constant 0 : index
    %c2_59 = arith.constant 2 : index
    %c0_60 = arith.constant 0 : index
    %c0_61 = arith.constant 0 : index
    %51 = vector.load %arg8[%c0_58, %c2_59, %c0_60, %c0_61] : memref<1x10x8x128xbf16, #tpu.memory_space<vmem>>, vector<1x8x8x128xbf16>
    %52 = vector.shape_cast %51 : vector<1x8x8x128xbf16> to vector<64x128xbf16>
    %c8 = arith.constant 8 : index
    %c0_62 = arith.constant 0 : index
    %c0_63 = arith.constant 0 : index
    %53 = vector.load %arg3[%c8, %c0_62, %c0_63] : memref<9x128x128xbf16, #tpu.memory_space<vmem>>, vector<1x128x128xbf16>
    %54 = vector.shape_cast %53 : vector<1x128x128xbf16> to vector<128x128xbf16>
    %cst_64 = arith.constant dense<0.000000e+00> : vector<64x128xf32>
    %55 = tpu.matmul %52, %54, %cst_64 {dimension_numbers = #tpu.dot_dimension_numbers<[1], [0], [0], [1], [0, 0, 1, 1], [], []>} : vector<64x128xbf16>, vector<128x128xbf16>, vector<64x128xf32> -> vector<64x128xf32>
    %56 = arith.addf %50, %55 : vector<64x128xf32>
    %57 = vector.broadcast %3 : vector<1x128xf32> to vector<64x128xf32>
    %58 = arith.addf %56, %57 : vector<64x128xf32>
    %cst_65 = arith.constant 0.000000e+00 : f32
    %59 = vector.broadcast %cst_65 : f32 to vector<64x128xf32>
    %60 = arith.maximumf %58, %59 : vector<64x128xf32>
    %61 = arith.truncf %60 : vector<64x128xf32> to vector<64x128xbf16>
    %62 = vector.shape_cast %61 : vector<64x128xbf16> to vector<1x8x8x128xbf16>
    %c0_66 = arith.constant 0 : index
    %c0_67 = arith.constant 0 : index
    %c0_68 = arith.constant 0 : index
    %c0_69 = arith.constant 0 : index
    %63 = vector.load %arg5[%c0_66, %c0_67, %c0_68, %c0_69] : memref<1x8x8x128xbf16, #tpu.memory_space<vmem>>, vector<1x8x8x128xbf16>
    tpu.vector_store %arg5[%c0_66, %c0_67, %c0_68, %c0_69], %62 {strides = array<i32>} : memref<1x8x8x128xbf16, #tpu.memory_space<vmem>>, vector<1x8x8x128xbf16>,
    return
  }
  func.func @transform_0(%arg0: i32, %arg1: i32) -> (i32, i32, i32, i32) {
    %c0_i32 = arith.constant 0 : i32
    %c0_i32_0 = arith.constant 0 : i32
    %c0_i32_1 = arith.constant 0 : i32
    %c0_i32_2 = arith.constant 0 : i32
    return %arg0, %c0_i32, %c0_i32_0, %c0_i32_1 : i32, i32, i32, i32
  }
  func.func @transform_1(%arg0: i32, %arg1: i32) -> (i32, i32, i32) {
    %c0_i32 = arith.constant 0 : i32
    %c0_i32_0 = arith.constant 0 : i32
    %c0_i32_1 = arith.constant 0 : i32
    return %c0_i32, %c0_i32_0, %arg1 : i32, i32, i32
  }
  func.func @transform_2(%arg0: i32, %arg1: i32) -> (i32, i32) {
    %c0_i32 = arith.constant 0 : i32
    %c0_i32_0 = arith.constant 0 : i32
    return %c0_i32, %arg1 : i32, i32
  }
  func.func @transform_3(%arg0: i32, %arg1: i32) -> (i32, i32, i32, i32) {
    %c0_i32 = arith.constant 0 : i32
    %c0_i32_0 = arith.constant 0 : i32
    %c0_i32_1 = arith.constant 0 : i32
    return %arg0, %c0_i32, %c0_i32_0, %arg1 : i32, i32, i32, i32
  }
}

</mosaic_0001>

<bundles_post_ra>
// kernel: tpu_custom_call.1
= control target key start
LH: loop header
LB: loop body
LE: loop exit
PB: predicated region body
PF: predicated region fallthrough
CT: control target
= control target key end

     0   :  { %8 = vsyncpa [#allocation6], 0  ;;  %s3269_s0 = inlined_call_operand.hbm [shape: f32[2,8,8,128], index: 0, kind: input, shape index: {}]   ;;  %s3270_s1 = inlined_call_operand.hbm [shape: bf16[9,128,128], index: 1, kind: input, shape index: {}]   ;;  %s3271_s2 = inlined_call_operand.vmem [shape: f32[1,128], index: 2, kind: input, shape index: {}]   ;;  %s3272_s3 = inlined_call_operand.hbm [shape: bf16[2,8,8,128], index: 3, kind: output, shape index: {}]  }
   0x1   :  { %10 = vsyncpa [#allocation6 + $0x1], 0 }
   0x2   :  { %11 = vsyncpa [#allocation9], 0 }
   0x3   :  { %12 = vsyncpa [#allocation7], 0 }
   0x4   :  { %14 = vsyncpa [#allocation7 + $0x1], 0  ;;  %s3018_s12 = smov 0   ;;  %s3020_s13 = smov 0  }
   0x5   :  { %s3022_s14 = smov 0   ;;  %s3024_s15 = smov 0  }
   0x6   :  { %s3026_s16 = smov 0   ;;  %s3028_s17 = smov 0  }
   0x7 LB: > { %s2098_s18 = sadd.s32 4294967295, %s2986_s17   ;;  %s2099_s19 = sadd.s32 4294967294, %s2986_s17   ;;  %s2986_s17 = sphi %s3028_s17, %s20_s17   ;;  %s2982_s16 = sphi %s3026_s16, %s3298_s16   ;;  %s2978_s15 = sphi %s3024_s15, %s3297_s15   ;;  %s2974_s14 = sphi %s3022_s14, %s3296_s14   ;;  %s2970_s13 = sphi %s3020_s13, %s3295_s13   ;;  %s2966_s12 = sphi %s3018_s12, %s3294_s12  }
   0x8   : > { %p52_p0 = scmp.ne.s32.totalorder %s2970_s13, %s2966_s12  ;;  %p3052_p1 = scmp.eq.s32.totalorder %s2098_s18, 0 }
   0x9   : > { %p3056_p2 = scmp.eq.s32.totalorder %s2098_s18, 1  ;;  %p136_p3 = scmp.eq.s32.totalorder %s2099_s19, 1 }
   0xa   : > { %p3062_p4 = por %p3052_p1, %p52_p0  ;;  %p2100_p5 = scmp.ge.s32.totalorder %s2986_s17, 1 }
   0xb   : > { %p3067_p6 = por %p136_p3, %p52_p0  ;;  %p143_p7 = scmp.lt.s32.totalorder %s2986_s17, 3 }
   0xc   : > { %s3276_s22 = scalar_select %p3062_p4, 1, 0 }
   0xd   : > { %s3277_s23 = scalar_select %p3067_p6, 1, 0 }
   0xe   : > { %p3072_p8 = pnand %p2100_p5, %p143_p7  ;;  %s2988_s25 = smov [#allocation8]  }
   0xf   : > { %s157_s26 = sshll.u32 %s2988_s25, 4  ;;  %s32_s28 = sadd.s32 1, %s2982_s16  ;;  %s158_s26 = int_to_ptr.vmem [resolvable:$true] %s157_s26 }
  0x10   : > { %p2668_p9 = pneg %p3072_p8  ;;  %s2859_s29 = scalar_lea.vmem %s158_s26, 9216 }
  0x11   : > { %p2860_p13 = scmp.ne.s32.totalorder %s158_s26, %s2859_s29  ;;  %p2867_p5 = scmp.lt.s32.totalorder %s158_s26, %s158_s26 }
  0x12   : > { %p3081_p11 = pnand %p2668_p9, %p3052_p1  ;;  %p2868_p7 = scmp.lt.s32.totalorder %s2859_s29, %s2859_s29 }
  0x14   : > { %p2850_p12 = pneg %p3081_p11  ;;  %p2869_p6 = por %p2868_p7, %p2867_p5 }
  0x16   : > { %p2862_p0 = pnand %p2860_p13, %p2850_p12 }
  0x18   : > { %p2863_p3 = pneg %p2862_p0 }
  0x1a   : > { %p2870_p4 = pnand %p2869_p6, %p2863_p3 }
  0x1c   : > { %2873 = shalt.err (!%p2870_p4)
}
  0x1d   : > { %s2989_s30 = smov 64   ;;  %s2990_s4 = smov 4  }
  0x1e   : > { %2671 = dma.hbm_to_vmem [thread:$0]  (!%p3081_p11), %s3270_s1, 9216, %s158_s26, [#allocation9], %s2989_s30, %s2989_s30, %s2990_s4  }
  0x1f   : > { %p34_p6 = scmp.ge.s32.totalorder %s32_s28, 2  ;;  %s39_s7 = sadd.s32 1, %s2974_s14 }
  0x20   : > { %p46_p4 = scmp.ne.s32.totalorder %s2974_s14, %s2970_s13  ;;  %p47_p9 = scmp.eq.s32.totalorder %s2986_s17, 0 }
  0x21   : > { %s3300_s28 = smov (%p34_p6, %s32_s28), 0  ;;  %p2681_p0 = scmp.lt.s32.totalorder %s2986_s17, 2 }
  0x22   : > { %p3099_p12 = por %p47_p9, %p46_p4  ;;  %p3105_p13 = por %p3056_p2, %p46_p4 }
  0x23   : > { %s36_s10 = ssub.s32 %s2982_s16, %s3300_s28  ;;  %s177_s11 = sand.u32 1, %s2974_s14  }
  0x24   : > { %p37_p11 = scmp.eq.s32.totalorder %s36_s10, 0  ;;  %s2104_s18 = sshll.u32 %s177_s11, 6 }
  0x25   : > { %s2233_s25 = sshll.u32 %s2982_s16, 10  ;;  %s181_s30 = scalar_lea.vmem [#allocation5], %s2104_s18 }
  0x26   : > { %s3114_s19 = scalar_select %p37_p11, %s2974_s14, %s39_s7  }
  0x27   : > { %s187_s29 = scalar_lea.hbm %s3269_s0, %s2233_s25  ;;  %s188_s4 = sshll.u32 %s181_s30, 4  ;;  %s189_s4 = int_to_ptr.vmem [resolvable:$true] %s188_s4 }
  0x28   : > { %p3122_p2 = pnand %p2681_p0, %p3099_p12  ;;  %s178_s5 = scalar_lea.sflag [#allocation6], %s177_s11 }
  0x29   : > { %s2887_s6 = scalar_lea.vmem %s189_s4, 1024  ;;  %s2991_s7 = smov [#allocation5]  }
  0x2a   : > { %p2876_p3 = pneg %p3122_p2  ;;  %p2888_p5 = scmp.ne.s32.totalorder %s189_s4, %s2887_s6 }
  0x2b   : > { %s2892_s10 = sshll.u32 %s2991_s7, 4  ;;  %s2893_s10 = int_to_ptr.vmem [resolvable:$false] %s2892_s10 }
  0x2c   : > { %p2890_p7 = pnand %p2888_p5, %p2876_p3  ;;  %s2894_s25 = scalar_lea.vmem %s2893_s10, 2048 }
  0x2d   : > { %p2895_p4 = scmp.lt.s32.totalorder %s189_s4, %s2893_s10  ;;  %p2896_p9 = scmp.lt.s32.totalorder %s2894_s25, %s2887_s6 }
  0x2e   : > { %p2891_p6 = pneg %p2890_p7 }
  0x2f   : > { %p2897_p11 = por %p2896_p9, %p2895_p4 }
  0x31   : > { %p2898_p10 = pnand %p2897_p11, %p2891_p6 }
  0x33   : > { %2901 = shalt.err (!%p2898_p10)
}
  0x34   : > { %s2992_s8 = smov 128   ;;  %s2993_s18 = smov 8  }
  0x35   : > { %2675 = dma.hbm_to_vmem [thread:$0]  (!%p3122_p2), %s187_s29, 1024, %s189_s4, %s178_s5, %s2992_s8, %s2992_s8, %s2993_s18  }
  0x36   : > { %200 = sbr.rel (%p3072_p8) target bundleno = 449 (0x1c1), region = 32 }
  0x3b   : > { %s3133_s11 = sand.u32 1, %s2970_s13   ;;  %p3283_p12 = scmp.ne.s32.totalorder %s3276_s22, 0 }
  0x3c   : > { %s2108_s26 = sshll.u32 %s3133_s11, 6  ;;  %s203_s27 = scalar_lea.sflag [#allocation6], %s3133_s11 }
  0x3d   : > { %s3137_s30 = scalar_lea.vmem [#allocation5], %s2108_s26 }
  0x3e   : > { %2953 = dma.done.wait (%p3283_p12), %s203_s27, 1024  }
  0x3f   : > { %2955 = vsyncadd (%p3283_p12), %s203_s27, 4294966272 }
  0x40   : > { %2957 = dma.done.wait (%p3052_p1), [#allocation9], 9216  }
  0x41   : > { %2959 = vsyncadd (%p3052_p1), [#allocation9], 4294958080  ;;  %v2994_v0 = vmov 0   ;;  %v2740_v1 = vld [vmem:[#allocation8 + $0x78] sm:$0xff]   ;;  %v2742_v3 = vld [vmem:[#allocation8 + $0x70] sm:$0xff]   ;;  %vm303_vm1 = vcmask 1040384  }
  0x42   : > { %252 = vst [vmem:[#allocation2] sm:$0xf] %v2994_v0  ;;  %254 = vst [vmem:[#allocation2 + $0x24] sm:$0xf] %v2994_v0  ;;  %v2741_v2 = vld [vmem:[#allocation8 + $0x38] sm:$0xff]   ;;  %2428 = vmatprep.subr.bf16.mxu0 %v2740_v1  ;;  %v2743_v4 = vld [vmem:[#allocation8 + $0x30] sm:$0xff]  }
  0x43   : > { %255 = vst [vmem:[#allocation3] sm:$0xf] %v2994_v0  ;;  %257 = vst [vmem:[#allocation3 + $0x24] sm:$0xf] %v2994_v0  ;;  %2452 = vmatprep.subr.bf16.mxu1 %v2741_v2  ;;  %2429 = vmatpush3.bf16.msra.mxu0 %v2740_v1  ;;  %v2744_v5 = vld [vmem:[#allocation8 + $0x68] sm:$0xff]   ;;  %v2746_v7 = vld [vmem:[#allocation8 + $0x60] sm:$0xff]  }
  0x44   : > { %258 = vst [vmem:[#allocation4] sm:$0xf] %v2994_v0  ;;  %260 = vst [vmem:[#allocation4 + $0x24] sm:$0xf] %v2994_v0  ;;  %2453 = vmatpush3.bf16.msra.mxu1 %v2741_v2  ;;  %2430 = vmatprep.subr.bf16.mxu0 %v2742_v3  ;;  %v2745_v6 = vld [vmem:[#allocation8 + $0x28] sm:$0xff]   ;;  %v2747_v8 = vld [vmem:[#allocation8 + $0x20] sm:$0xff]  }
  0x45   : > { %2454 = vmatprep.subr.bf16.mxu1 %v2743_v4  ;;  %vm304_vm0 = vsmask.f32 256  ;;  %v2748_v10 = vld [vmem:[#allocation8 + $0x58] sm:$0xff]   ;;  %v2750_v12 = vld [vmem:[#allocation8 + $0x50] sm:$0xff]   ;;  %v244_v14 = vld [vmem:[%s3137_s30] sm:$0xff]  ;;  %vm361_vm4 = vcmask 1043459  }
  0x46   : > { %vm3147_vm2 = vmand %vm303_vm1, %vm304_vm0  ;;  %v2749_v11 = vld [vmem:[#allocation8 + $0x18] sm:$0xff]   ;;  %v2751_v13 = vld [vmem:[#allocation8 + $0x10] sm:$0xff]   ;;  %v261_v16 = vpack.c.bf16 %v244_v14, %v244_v14  ;;  %v278_v17 = vrot.slane %v244_v14, 7  ;;  %v336_v29 = vrot.slane %v244_v14, 1  ;;  %vm362_vm3 = vsmask.f32 7950 }
  0x47   : > { %2431 = vmatpush3.bf16.msra.mxu0 %v2742_v3  ;;  %v245_v19 = vld [vmem:[%s3137_s30 + $0x8] sm:$0xff]  ;;  %v246_v20 = vld [vmem:[%s3137_s30 + $0x10] sm:$0xff]  ;;  %v2754_v33 = vld [vmem:[#allocation8 + $0x40] sm:$0xff]   ;;  %s2110_s24 = sshll.u32 %s3133_s11, 5  ;;  %s2242_s21 = sshll.u32 %s2978_s15, 9 }
  0x48   : > { %2455 = vmatpush3.bf16.msra.mxu1 %v2743_v4  ;;  %2432 = vmatprep.subr.bf16.mxu0 %v2744_v5  ;;  %v2246_v21 = vpack.c.bf16 %v246_v20, %v245_v19  ;;  %v337_v22 = vrot.slane %v245_v19, 1  ;;  %v338_v23 = vrot.slane %v246_v20, 1  ;;  %v279_v24 = vrot.slane %v245_v19, 7  ;;  %270 = vst [vmem:[#allocation2 + $0x4] sm:$0xf] %v261_v16  ;;  %v2752_v27 = vld [vmem:[#allocation8 + $0x48] sm:$0xff]   ;;  %vm3168_vm5 = vmand %vm361_vm4, %vm362_vm3  ;;  %s3221_s7 = scalar_lea.hbm %s3272_s3, %s2242_s21 }
  0x49   : > { %2456 = vmatprep.subr.bf16.mxu1 %v2745_v6  ;;  %v286_v25 = vpack.c.bf16 %v278_v17, %v278_v17  ;;  %v280_v26 = vrot.slane %v246_v20, 7  ;;  %v2753_v30 = vld [vmem:[#allocation8 + $0x8] sm:$0xff]   ;;  %v344_v32 = vpack.c.bf16 %v336_v29, %v336_v29  ;;  %v2755_v34 = vld [vmem:[#allocation8] sm:$0xff]   ;;  %v2760_v36 = vld [vmem:[#allocation8 + $0xb8] sm:$0xff]   ;;  %s235_s29 = scalar_lea.vmem [#allocation10], %s2110_s24  ;;  %s1977_s10 = scalar_lea.sflag [#allocation7], %s3133_s11 }
  0x4a   : > { %v306_v15 = vld [vmem:[#allocation3] sm:$0x1]  ;;  %2308 = vst [vmem:[#allocation2 + $0x8] sm:$0xff] %v2246_v21   ;;  %v2276_v28 = vpack.c.bf16 %v338_v23, %v337_v22  ;;  %v2761_v39 = vld [vmem:[#allocation8 + $0xf8] sm:$0xff]   ;;  %v248_v47 = vld [vmem:[%s3137_s30 + $0x20] sm:$0xff]  ;;  %s1991_s4 = sshll.u32 %s235_s29, 4  ;;  %s3216_s4 = int_to_ptr.vmem [resolvable:$true] %s1991_s4 }
  0x4b   : > { %2433 = vmatpush3.bf16.msra.mxu0 %v2744_v5  ;;  %v307_v18 = vsel %vm3147_vm2, 0, %v306_v15  ;;  %295 = vst [vmem:[#allocation3 + $0x4] sm:$0xf] %v286_v25  ;;  %v2261_v31 = vpack.c.bf16 %v280_v26, %v279_v24  ;;  %353 = vst [vmem:[#allocation4 + $0x4] sm:$0xf] %v344_v32  ;;  %v2762_v43 = vld [vmem:[#allocation8 + $0xb0] sm:$0xff]  }
  0x4c   : > { %2457 = vmatpush3.bf16.msra.mxu1 %v2745_v6  ;;  %2434 = vmatprep.subr.bf16.mxu0 %v2746_v7  ;;  %308 = vst [vmem:[#allocation3] sm:$0x1] %v307_v18  ;;  %2314 = vst [vmem:[#allocation4 + $0x8] sm:$0xff] %v2276_v28   ;;  %v247_v46 = vld [vmem:[%s3137_s30 + $0x18] sm:$0xff]  ;;  %v249_v48 = vld [vmem:[%s3137_s30 + $0x28] sm:$0xff]  ;;  %v282_v51 = vrot.slane %v248_v47, 7 }
  0x4d   : > { %2458 = vmatprep.subr.bf16.mxu1 %v2747_v8  ;;  %2311 = vst [vmem:[#allocation3 + $0x8] sm:$0xff] %v2261_v31   ;;  %v2251_v49 = vpack.c.bf16 %v248_v47, %v247_v46  ;;  %v281_v50 = vrot.slane %v247_v46, 7  ;;  %v250_v52 = vld [vmem:[%s3137_s30 + $0x30] sm:$0xff]  ;;  %v283_v53 = vrot.slane %v249_v48, 7  ;;  %v339_v57 = vrot.slane %v247_v46, 1  ;;  %v2764_v61 = vld [vmem:[#allocation8 + $0xa8] sm:$0xff]  }
  0x4e   : > { %v2256_v54 = vpack.c.bf16 %v250_v52, %v249_v48  ;;  %v284_v55 = vrot.slane %v250_v52, 7  ;;  %v340_v60 = vrot.slane %v248_v47, 1  ;;  %v341_v62 = vrot.slane %v249_v48, 1  ;;  %v2763_v2 = vld [vmem:[#allocation8 + $0xf0] sm:$0xff]   ;;  %v2766_v5 = vld [vmem:[#allocation8 + $0xa0] sm:$0xff]   ;;  %v2769_v29 = vld [vmem:[#allocation8 + $0xd8] sm:$0xff]  }
  0x4f   : > { %2435 = vmatpush3.bf16.msra.mxu0 %v2746_v7  ;;  %v2756_v35 = vld [vmem:[#allocation2] sm:$0xff]   ;;  %2309 = vst [vmem:[#allocation2 + $0x10] sm:$0xff] %v2251_v49   ;;  %v2266_v56 = vpack.c.bf16 %v282_v51, %v281_v50  ;;  %v342_v1 = vrot.slane %v250_v52, 1  ;;  %v364_v6 = vld [vmem:[#allocation4] sm:$0x8]  ;;  %v2767_v21 = vld [vmem:[#allocation8 + $0xe0] sm:$0xff]  }
  0x50   : > { %2459 = vmatpush3.bf16.msra.mxu1 %v2747_v8  ;;  %2436 = vmatprep.subr.bf16.mxu0 %v2748_v10  ;;  %2310 = vst [vmem:[#allocation2 + $0x18] sm:$0xff] %v2256_v54   ;;  %v2271_v58 = vpack.c.bf16 %v284_v55, %v283_v53  ;;  %v2281_v0 = vpack.c.bf16 %v340_v60, %v339_v57  ;;  %v2765_v8 = vld [vmem:[#allocation8 + $0xe8] sm:$0xff]   ;;  %v2774_v28 = vld [vmem:[#allocation8 + $0x90] sm:$0xff]   ;;  %v251_v46 = vld [vmem:[%s3137_s30 + $0x38] sm:$0xff]  ;;  %s2902_s25 = scalar_lea.vmem %s3216_s4, 512  ;;  %s2995_s15 = smov [#allocation10]  }
  0x51   : > { %2460 = vmatprep.subr.bf16.mxu1 %v2749_v11  ;;  %2444 = vmatprep.mubr.bf16.mxu0 %v2756_v35  ;;  %v2758_v40 = vld [vmem:[#allocation2 + $0x8] sm:$0xff]   ;;  %2312 = vst [vmem:[#allocation3 + $0x10] sm:$0xff] %v2266_v56   ;;  %v2286_v4 = vpack.c.bf16 %v342_v1, %v341_v62  ;;  %v2776_v31 = vld [vmem:[#allocation8 + $0x88] sm:$0xff]   ;;  %v2779_v47 = vld [vmem:[#allocation8 + $0xc0] sm:$0xff]   ;;  %v285_v49 = vrot.slane %v251_v46, 7  ;;  %v268_v50 = vpack.c.bf16 %v251_v46, %v251_v46  ;;  %v343_v52 = vrot.slane %v251_v46, 1  ;;  %p2903_p1 = scmp.ne.s32.totalorder %s3216_s4, %s2902_s25 }
  0x52   : > { %v309_v37 = vld [vmem:[#allocation3 + $0x4] sm:$0x1]  ;;  %2313 = vst [vmem:[#allocation3 + $0x18] sm:$0xff] %v2271_v58   ;;  %2315 = vst [vmem:[#allocation4 + $0x10] sm:$0xff] %v2281_v0   ;;  %v367_v7 = vld [vmem:[#allocation4 + $0x4] sm:$0x8] }
  0x53   : > { %2437 = vmatpush3.bf16.msra.mxu0 %v2748_v10  ;;  %v310_v38 = vsel %vm3147_vm2, 0, %v309_v37  ;;  %2316 = vst [vmem:[#allocation4 + $0x18] sm:$0xff] %v2286_v4   ;;  %v368_v14 = vsel %vm3168_vm5, 0, %v367_v7  ;;  %v370_v24 = vld [vmem:[#allocation4 + $0x8] sm:$0x8]  ;;  %v2784_v48 = vld [vmem:[#allocation8 + $0x138] sm:$0xff]   ;;  %v293_v53 = vpack.c.bf16 %v285_v49, %v285_v49  ;;  %v351_v55 = vpack.c.bf16 %v343_v52, %v343_v52  ;;  %p2904_p8 = pnand %p2903_p1, %p3105_p13 }
  0x54   : > { %2461 = vmatpush3.bf16.msra.mxu1 %v2749_v11  ;;  %2438 = vmatprep.subr.bf16.mxu0 %v2750_v12  ;;  %311 = vst [vmem:[#allocation3 + $0x4] sm:$0x1] %v310_v38  ;;  %v312_v41 = vld [vmem:[#allocation3 + $0x8] sm:$0x1]  ;;  %v315_v42 = vld [vmem:[#allocation3 + $0xc] sm:$0x1] }
  0x55   : > { %2462 = vmatprep.subr.bf16.mxu1 %v2751_v13  ;;  %v313_v44 = vsel %vm3147_vm2, 0, %v312_v41  ;;  %v316_v45 = vsel %vm3147_vm2, 0, %v315_v42  ;;  %v365_v11 = vsel %vm3168_vm5, 0, %v364_v6  ;;  %369 = vst [vmem:[#allocation4 + $0x4] sm:$0x8] %v368_v14  ;;  %v371_v26 = vsel %vm3168_vm5, 0, %v370_v24  ;;  %p2905_p10 = pneg %p2904_p8 }
  0x56   : > { %314 = vst [vmem:[#allocation3 + $0x8] sm:$0x1] %v313_v44  ;;  %317 = vst [vmem:[#allocation3 + $0xc] sm:$0x1] %v316_v45  ;;  %v2770_v10 = vld [vmem:[#allocation2 + $0x10] sm:$0xff]   ;;  %v2778_v41 = vld [vmem:[#allocation8 + $0x80] sm:$0xff]  }
  0x57   : > { %2439 = vmatpush3.bf16.msra.mxu0 %v2750_v12  ;;  %v2768_v12 = vld [vmem:[#allocation8 + $0x98] sm:$0xff]   ;;  %366 = vst [vmem:[#allocation4] sm:$0x8] %v365_v11  ;;  %v373_v25 = vld [vmem:[#allocation4 + $0xc] sm:$0x8]  ;;  %v2777_v45 = vld [vmem:[#allocation8 + $0xc8] sm:$0xff]  }
  0x58   : > { %2463 = vmatpush3.bf16.msra.mxu1 %v2751_v13  ;;  %2440 = vmatprep.subr.bf16.mxu0 %v2752_v27  ;;  %v2772_v13 = vld [vmem:[#allocation2 + $0x18] sm:$0xff]   ;;  %372 = vst [vmem:[#allocation4 + $0x8] sm:$0x8] %v371_v26  ;;  %277 = vst [vmem:[#allocation2 + $0x20] sm:$0xf] %v268_v50  ;;  %v2786_v54 = vld [vmem:[#allocation8 + $0x130] sm:$0xff]  }
  0x59   : > { %2464 = vmatprep.subr.bf16.mxu1 %v2753_v30  ;;  %v318_v15 = vld [vmem:[#allocation3 + $0x10] sm:$0x1]  ;;  %v321_v16 = vld [vmem:[#allocation3 + $0x14] sm:$0x1]  ;;  %v324_v19 = vld [vmem:[#allocation3 + $0x18] sm:$0x1] }
  0x5a   : > { %v319_v17 = vsel %vm3147_vm2, 0, %v318_v15  ;;  %v322_v18 = vsel %vm3147_vm2, 0, %v321_v16  ;;  %v327_v20 = vld [vmem:[#allocation3 + $0x1c] sm:$0x1]  ;;  %v325_v22 = vsel %vm3147_vm2, 0, %v324_v19  ;;  %v2785_v57 = vld [vmem:[#allocation8 + $0x178] sm:$0xff]  }
  0x5b   : > { %2441 = vmatpush3.bf16.msra.mxu0 %v2752_v27  ;;  %v2757_v63 = vld [vmem:[#allocation3] sm:$0xff]   ;;  %320 = vst [vmem:[#allocation3 + $0x10] sm:$0x1] %v319_v17  ;;  %323 = vst [vmem:[#allocation3 + $0x14] sm:$0x1] %v322_v18  ;;  %v328_v23 = vsel %vm3147_vm2, 0, %v327_v20 }
  0x5c   : > { %2465 = vmatpush3.bf16.msra.mxu1 %v2753_v30  ;;  %2442 = vmatprep.subr.bf16.mxu0 %v2754_v33  ;;  %326 = vst [vmem:[#allocation3 + $0x18] sm:$0x1] %v325_v22  ;;  %329 = vst [vmem:[#allocation3 + $0x1c] sm:$0x1] %v328_v23  ;;  %v374_v27 = vsel %vm3168_vm5, 0, %v373_v25  ;;  %v2787_v60 = vld [vmem:[#allocation8 + $0x170] sm:$0xff]  }
  0x5d   : > { %2466 = vmatprep.subr.bf16.mxu1 %v2755_v34  ;;  %2468 = vmatprep.mubr.bf16.mxu1 %v2757_v63  ;;  %v2759_v3 = vld [vmem:[#allocation3 + $0x8] sm:$0xff]   ;;  %375 = vst [vmem:[#allocation4 + $0xc] sm:$0x8] %v374_v27  ;;  %v376_v35 = vld [vmem:[#allocation4 + $0x10] sm:$0x8]  ;;  %v2795_v6 = vld [vmem:[#allocation8 + $0x160] sm:$0xff]  }
  0x5e   : > { %v2780_v30 = vld [vmem:[#allocation4] sm:$0xff]   ;;  %v377_v37 = vsel %vm3168_vm5, 0, %v376_v35  ;;  %v379_v38 = vld [vmem:[#allocation4 + $0x14] sm:$0x8]  ;;  %302 = vst [vmem:[#allocation3 + $0x20] sm:$0xf] %v293_v53 }
  0x5f   : > { %2443 = vmatpush3.bf16.msra.mxu0 %v2754_v33  ;;  %v2781_v32 = vld [vmem:[#allocation3 + $0x4] sm:$0xff]   ;;  %378 = vst [vmem:[#allocation4 + $0x10] sm:$0x8] %v377_v37  ;;  %v380_v42 = vsel %vm3168_vm5, 0, %v379_v38  ;;  %360 = vst [vmem:[#allocation4 + $0x20] sm:$0xf] %v351_v55 }
  0x60   : > { %2467 = vmatpush3.bf16.msra.mxu1 %v2755_v34  ;;  %2476 = vmatprep.subr.bf16.mxu0 %v2760_v36  ;;  %381 = vst [vmem:[#allocation4 + $0x14] sm:$0x8] %v380_v42  ;;  %v2791_v4 = vld [vmem:[#allocation8 + $0x168] sm:$0xff]   ;;  %v2805_v7 = vld [vmem:[#allocation4 + $0x4] sm:$0xff]   ;;  %v2806_v20 = vld [vmem:[#allocation2 + $0xc] sm:$0xff]   ;;  %s2906_s8 = sshll.u32 %s2995_s15, 4  ;;  %s2907_s8 = int_to_ptr.vmem [resolvable:$false] %s2906_s8 }
  0x61   : > { %2500 = vmatprep.subr.bf16.mxu1 %v2761_v39  ;;  %v2797_v11 = vld [vmem:[#allocation8 + $0x158] sm:$0xff]   ;;  %v2802_v16 = vld [vmem:[#allocation8 + $0x100] sm:$0xff]   ;;  %v2801_v17 = vld [vmem:[#allocation8 + $0x148] sm:$0xff]   ;;  %s2908_s18 = scalar_lea.vmem %s2907_s8, 1024  ;;  %p2909_p0 = scmp.lt.s32.totalorder %s3216_s4, %s2907_s8 }
  0x62   : > { %2445 = vmatmul.mubr.bf16.vlgmr.msra.gmra.mxu0 %v2758_v40  ;;  %v2771_v33 = vld [vmem:[#allocation3 + $0x10] sm:$0xff]   ;;  %v385_v40 = vld [vmem:[#allocation4 + $0x1c] sm:$0x8]  ;;  %v2808_v18 = vld [vmem:[#allocation8 + $0x1b8] sm:$0xff]   ;;  %p2910_p2 = scmp.lt.s32.totalorder %s2908_s18, %s2902_s25 }
  0x63   : > { %2477 = vmatpush3.bf16.msra.mxu0 %v2760_v36  ;;  %2469 = vmatmul.mubr.bf16.vlgmr.msra.gmra.mxu1 %v2759_v3  ;;  %v2773_v34 = vld [vmem:[#allocation3 + $0x18] sm:$0xff]   ;;  %v2775_v36 = vld [vmem:[#allocation8 + $0xd0] sm:$0xff]   ;;  %v386_v44 = vsel %vm3168_vm5, 0, %v385_v40  ;;  %v2783_v58 = vld [vmem:[#allocation3 + $0xc] sm:$0xff]  }
  0x64   : > { %2478 = vmatprep.subr.bf16.mxu0 %v2762_v43  ;;  %2501 = vmatpush3.bf16.msra.mxu1 %v2761_v39  ;;  %v382_v39 = vld [vmem:[#allocation4 + $0x18] sm:$0x8]  ;;  %387 = vst [vmem:[#allocation4 + $0x1c] sm:$0x8] %v386_v44  ;;  %v2782_v51 = vld [vmem:[#allocation4 + $0x8] sm:$0xff]   ;;  %v2809_v23 = vld [vmem:[#allocation8 + $0x1f8] sm:$0xff]   ;;  %p2911_p3 = por %p2910_p2, %p2909_p0 }
  0x65   : > { %2502 = vmatprep.subr.bf16.mxu1 %v2763_v2  ;;  %2448 = vmatprep.mubr.bf16.mxu0 %v2770_v10  ;;  %v2792_v62 = vld [vmem:[#allocation3 + $0x14] sm:$0xff]   ;;  %v330_v0 = vld [vmem:[#allocation3 + $0x20] sm:$0x1]  ;;  %v2821_v9 = vld [vmem:[#allocation8 + $0x1d8] sm:$0xff]  }
  0x66   : > { %2472 = vmatprep.mubr.bf16.mxu1 %v2771_v33  ;;  %v331_v1 = vsel %vm3147_vm2, 0, %v330_v0  ;;  %v2804_v3 = vld [vmem:[#allocation2 + $0x4] sm:$0xff]   ;;  %v388_v14 = vld [vmem:[#allocation4 + $0x20] sm:$0x8]  ;;  %v2803_v19 = vld [vmem:[#allocation8 + $0x140] sm:$0xff]   ;;  %p2912_p5 = pnand %p2911_p3, %p2905_p10 }
  0x67   : > { %2479 = vmatpush3.bf16.msra.mxu0 %v2762_v43  ;;  %v383_v43 = vsel %vm3168_vm5, 0, %v382_v39  ;;  %v2788_v56 = vld [vmem:[#allocation4 + $0x10] sm:$0xff]   ;;  %332 = vst [vmem:[#allocation3 + $0x20] sm:$0x1] %v331_v1  ;;  %v2798_v10 = vld [vmem:[#allocation8 + $0x110] sm:$0xff]   ;;  %v389_v15 = vsel %vm3168_vm5, 0, %v388_v14 }
  0x68   : > { %2480 = vmatprep.subr.bf16.mxu0 %v2764_v61  ;;  %2503 = vmatpush3.bf16.msra.mxu1 %v2763_v2  ;;  %384 = vst [vmem:[#allocation4 + $0x18] sm:$0x8] %v383_v43  ;;  %v2794_v2 = vld [vmem:[#allocation8 + $0x120] sm:$0xff]   ;;  %390 = vst [vmem:[#allocation4 + $0x20] sm:$0x8] %v389_v15  ;;  %v2810_v22 = vld [vmem:[#allocation8 + $0x1b0] sm:$0xff]  }
  0x69   : > { %2504 = vmatprep.subr.bf16.mxu1 %v2765_v8  ;;  %v2807_v24 = vld [vmem:[#allocation4 + $0xc] sm:$0xff]   ;;  %v2811_v25 = vld [vmem:[#allocation8 + $0x1f0] sm:$0xff]   ;;  %v391_v40 = vld [vmem:[#allocation4 + $0x24] sm:$0x8] }
  0x6a   : > { %2449 = vmatmul.mubr.bf16.gmra.mxu0 %v2772_v13  ;;  %v2799_v13 = vld [vmem:[#allocation8 + $0x150] sm:$0xff]   ;;  %v2814_v26 = vld [vmem:[#allocation8 + $0x1a8] sm:$0xff]   ;;  %v2819_v37 = vld [vmem:[#allocation8 + $0x1e0] sm:$0xff]  }
  0x6b   : > { %2481 = vmatpush3.bf16.msra.mxu0 %v2764_v61  ;;  %2492 = vmatprep.mubr.bf16.mxu0 %v2780_v30  ;;  %v2790_v61 = vld [vmem:[#allocation8 + $0x128] sm:$0xff]   ;;  %v2818_v30 = vld [vmem:[#allocation8 + $0x1a0] sm:$0xff]   ;;  %v2822_v38 = vld [vmem:[#allocation8 + $0x190] sm:$0xff]  }
  0x6c   : > { %2482 = vmatprep.subr.bf16.mxu0 %v2766_v5  ;;  %2505 = vmatpush3.bf16.msra.mxu1 %v2765_v8  ;;  %v2815_v33 = vld [vmem:[#allocation8 + $0x1e8] sm:$0xff]   ;;  %v2823_v42 = vld [vmem:[#allocation8 + $0x1d0] sm:$0xff]   ;;  %v2826_v43 = vld [vmem:[#allocation8 + $0x180] sm:$0xff]  }
  0x6d   : > { %2506 = vmatprep.subr.bf16.mxu1 %v2767_v21  ;;  %2473 = vmatmul.mubr.bf16.gmra.mxu1 %v2773_v34  ;;  %v2820_v34 = vld [vmem:[#allocation8 + $0x198] sm:$0xff]   ;;  %v2824_v39 = vld [vmem:[#allocation8 + $0x188] sm:$0xff]   ;;  %v2827_v46 = vld [vmem:[#allocation8 + $0x1c0] sm:$0xff]  }
  0x6e   : > { %2516 = vmatprep.mubr.bf16.mxu1 %v2781_v32  ;;  %v2793_v8 = vld [vmem:[#allocation3 + $0x1c] sm:$0xff]   ;;  %v2831_v49 = vld [vmem:[#allocation2 + $0x10] sm:$0xff]   ;;  %v2844_v53 = vld [vmem:[#allocation4 + $0x8] sm:$0xff]  }
  0x6f   : > { %2483 = vmatpush3.bf16.msra.mxu0 %v2766_v5  ;;  %v2789_v63 = vld [vmem:[#allocation4 + $0x18] sm:$0xff]   ;;  %v2796_v5 = vld [vmem:[#allocation8 + $0x118] sm:$0xff]   ;;  %v2825_v44 = vld [vmem:[#allocation8 + $0x1c8] sm:$0xff]  }
  0x70   : > { %2484 = vmatprep.subr.bf16.mxu0 %v2768_v12  ;;  %2507 = vmatpush3.bf16.msra.mxu1 %v2767_v21  ;;  %v2812_v21 = vld [vmem:[#allocation2 + $0x14] sm:$0xff]   ;;  %v2816_v27 = vld [vmem:[#allocation4 + $0x14] sm:$0xff]   ;;  %v2817_v35 = vld [vmem:[#allocation4 + $0x1c] sm:$0xff]  }
  0x71   : > { %2508 = vmatprep.subr.bf16.mxu1 %v2769_v29  ;;  %v2833_v59 = vld [vmem:[#allocation8 + $0x230] sm:$0xff]   ;;  %v2836_v50 = vld [vmem:[#allocation8 + $0x228] sm:$0xff]  }
  0x72   : > { %v2838_v55 = vld [vmem:[#allocation2 + $0x20] sm:$0xff]  }
  0x73   : > { %2485 = vmatpush3.bf16.msra.mxu0 %v2768_v12  ;;  %v2800_v12 = vld [vmem:[#allocation8 + $0x108] sm:$0xff]  }
  0x74   : > { %2486 = vmatprep.subr.bf16.mxu0 %v2774_v28  ;;  %2509 = vmatpush3.bf16.msra.mxu1 %v2769_v29  ;;  %v2828_v29 = vld [vmem:[#allocation3 + $0x8] sm:$0xff]  }
  0x75   : > { %2510 = vmatprep.subr.bf16.mxu1 %v2775_v36 }
  0x77   : > { %2487 = vmatpush3.bf16.msra.mxu0 %v2774_v28  ;;  %v2813_v28 = vld [vmem:[#allocation2 + $0x1c] sm:$0xff]  }
  0x78   : > { %2488 = vmatprep.subr.bf16.mxu0 %v2776_v31  ;;  %2511 = vmatpush3.bf16.msra.mxu1 %v2775_v36  ;;  %v2829_v36 = vld [vmem:[#allocation2 + $0x8] sm:$0xff]  }
  0x79   : > { %2512 = vmatprep.subr.bf16.mxu1 %v2777_v45 }
  0x7b   : > { %2489 = vmatpush3.bf16.msra.mxu0 %v2776_v31  ;;  %v333_v31 = vld [vmem:[#allocation3 + $0x24] sm:$0x1] }
  0x7c   : > { %2490 = vmatprep.subr.bf16.mxu0 %v2778_v41  ;;  %2513 = vmatpush3.bf16.msra.mxu1 %v2777_v45  ;;  %v334_v32 = vsel %vm3147_vm2, 0, %v333_v31  ;;  %v2832_v45 = vld [vmem:[#allocation8 + $0x238] sm:$0xff]  }
  0x7d   : > { %2514 = vmatprep.subr.bf16.mxu1 %v2779_v47  ;;  %335 = vst [vmem:[#allocation3 + $0x24] sm:$0x1] %v334_v32 }
  0x7f   : > { %2491 = vmatpush3.bf16.msra.mxu0 %v2778_v41  ;;  %v392_v41 = vsel %vm3168_vm5, 0, %v391_v40 }
  0x80   : > { %2524 = vmatprep.subr.bf16.mxu0 %v2784_v48  ;;  %2515 = vmatpush3.bf16.msra.mxu1 %v2779_v47  ;;  %393 = vst [vmem:[#allocation4 + $0x24] sm:$0x8] %v392_v41  ;;  %v2830_v47 = vld [vmem:[#allocation3 + $0x10] sm:$0xff]  }
  0x81   : > { %2548 = vmatprep.subr.bf16.mxu1 %v2785_v57 }
  0x82   : > { %2493 = vmatmul.mubr.bf16.vlgmr.msra.gmra.mxu0 %v2782_v51  ;;  %v2837_v51 = vld [vmem:[#allocation2 + $0x18] sm:$0xff]  }
  0x83   : > { %2525 = vmatpush3.bf16.msra.mxu0 %v2784_v48  ;;  %2496 = vmatprep.mubr.bf16.mxu0 %v2788_v56  ;;  %v2834_v48 = vld [vmem:[#allocation3 + $0x18] sm:$0xff]   ;;  %v2840_v56 = vld [vmem:[#allocation8 + $0x218] sm:$0xff]  }
  0x84   : > { %2526 = vmatprep.subr.bf16.mxu0 %v2786_v54  ;;  %2517 = vmatmul.mubr.bf16.vlgmr.msra.gmra.mxu1 %v2783_v58  ;;  %v2835_v52 = vld [vmem:[#allocation3 + $0x20] sm:$0xff]  }
  0x85   : > { %2549 = vmatpush3.bf16.msra.mxu1 %v2785_v57  ;;  %2520 = vmatprep.mubr.bf16.mxu1 %v2792_v62  ;;  %v2845_v57 = vld [vmem:[#allocation4 + $0x18] sm:$0xff]   ;;  %v2846_v62 = vld [vmem:[#allocation4 + $0x10] sm:$0xff]  }
  0x86   : > { %2550 = vmatprep.subr.bf16.mxu1 %v2787_v60  ;;  %v2841_v58 = vld [vmem:[#allocation8 + $0x210] sm:$0xff]  }
  0x87   : > { %2527 = vmatpush3.bf16.msra.mxu0 %v2786_v54  ;;  %v2839_v54 = vld [vmem:[#allocation8 + $0x220] sm:$0xff]  }
  0x88   : > { %2528 = vmatprep.subr.bf16.mxu0 %v2790_v61 }
  0x89   : > { %2551 = vmatpush3.bf16.msra.mxu1 %v2787_v60  ;;  %v2842_v60 = vld [vmem:[#allocation8 + $0x208] sm:$0xff]  }
  0x8a   : > { %2497 = vmatmul.mubr.bf16.gmra.mxu0 %v2789_v63  ;;  %2552 = vmatprep.subr.bf16.mxu1 %v2791_v4  ;;  %v2847_v63 = vld [vmem:[#allocation4 + $0x20] sm:$0xff]  }
  0x8b   : > { %2529 = vmatpush3.bf16.msra.mxu0 %v2790_v61  ;;  %2540 = vmatprep.mubr.bf16.mxu0 %v2804_v3  ;;  %v2843_v61 = vld [vmem:[#allocation8 + $0x200] sm:$0xff]  }
  0x8c   : > { %2530 = vmatprep.subr.bf16.mxu0 %v2794_v2  ;;  %2521 = vmatmul.mubr.bf16.gmra.mxu1 %v2793_v8 }
  0x8d   : > { %2553 = vmatpush3.bf16.msra.mxu1 %v2791_v4  ;;  %2564 = vmatprep.mubr.bf16.mxu1 %v2805_v7 }
  0x8e   : > { %2554 = vmatprep.subr.bf16.mxu1 %v2795_v6 }
  0x8f   : > { %2531 = vmatpush3.bf16.msra.mxu0 %v2794_v2 }
  0x90   : > { %2532 = vmatprep.subr.bf16.mxu0 %v2796_v5 }
  0x91   : > { %2555 = vmatpush3.bf16.msra.mxu1 %v2795_v6 }
  0x92   : > { %2556 = vmatprep.subr.bf16.mxu1 %v2797_v11 }
  0x93   : > { %2533 = vmatpush3.bf16.msra.mxu0 %v2796_v5 }
  0x94   : > { %2534 = vmatprep.subr.bf16.mxu0 %v2798_v10 }
  0x95   : > { %2557 = vmatpush3.bf16.msra.mxu1 %v2797_v11 }
  0x96   : > { %2558 = vmatprep.subr.bf16.mxu1 %v2799_v13 }
  0x97   : > { %2535 = vmatpush3.bf16.msra.mxu0 %v2798_v10 }
  0x98   : > { %2536 = vmatprep.subr.bf16.mxu0 %v2800_v12 }
  0x99   : > { %2559 = vmatpush3.bf16.msra.mxu1 %v2799_v13 }
  0x9a   : > { %2560 = vmatprep.subr.bf16.mxu1 %v2801_v17 }
  0x9b   : > { %2537 = vmatpush3.bf16.msra.mxu0 %v2800_v12 }
  0x9c   : > { %2538 = vmatprep.subr.bf16.mxu0 %v2802_v16 }
  0x9d   : > { %2561 = vmatpush3.bf16.msra.mxu1 %v2801_v17 }
  0x9e   : > { %2562 = vmatprep.subr.bf16.mxu1 %v2803_v19 }
  0x9f   : > { %2539 = vmatpush3.bf16.msra.mxu0 %v2802_v16 }
  0xa0   : > { %2572 = vmatprep.subr.bf16.mxu0 %v2808_v18 }
  0xa1   : > { %2563 = vmatpush3.bf16.msra.mxu1 %v2803_v19 }
  0xa2   : > { %2541 = vmatmul.mubr.bf16.vlgmr.msra.gmra.mxu0 %v2806_v20  ;;  %2596 = vmatprep.subr.bf16.mxu1 %v2809_v23 }
  0xa3   : > { %2573 = vmatpush3.bf16.msra.mxu0 %v2808_v18  ;;  %2544 = vmatprep.mubr.bf16.mxu0 %v2812_v21 }
  0xa4   : > { %2574 = vmatprep.subr.bf16.mxu0 %v2810_v22  ;;  %2565 = vmatmul.mubr.bf16.vlgmr.msra.gmra.mxu1 %v2807_v24 }
  0xa5   : > { %2597 = vmatpush3.bf16.msra.mxu1 %v2809_v23  ;;  %2568 = vmatprep.mubr.bf16.mxu1 %v2816_v27 }
  0xa6   : > { %2598 = vmatprep.subr.bf16.mxu1 %v2811_v25 }
  0xa7   : > { %2575 = vmatpush3.bf16.msra.mxu0 %v2810_v22 }
  0xa8   : > { %2576 = vmatprep.subr.bf16.mxu0 %v2814_v26 }
  0xa9   : > { %2599 = vmatpush3.bf16.msra.mxu1 %v2811_v25 }
  0xaa   : > { %2545 = vmatmul.mubr.bf16.gmra.mxu0 %v2813_v28  ;;  %2600 = vmatprep.subr.bf16.mxu1 %v2815_v33 }
  0xab   : > { %2577 = vmatpush3.bf16.msra.mxu0 %v2814_v26  ;;  %2588 = vmatprep.mubr.bf16.mxu0 %v2828_v29 }
  0xac   : > { %2578 = vmatprep.subr.bf16.mxu0 %v2818_v30  ;;  %2569 = vmatmul.mubr.bf16.gmra.mxu1 %v2817_v35 }
  0xad   : > { %2601 = vmatpush3.bf16.msra.mxu1 %v2815_v33  ;;  %2612 = vmatprep.mubr.bf16.mxu1 %v2829_v36 }
  0xae   : > { %2602 = vmatprep.subr.bf16.mxu1 %v2819_v37 }
  0xaf   : > { %2579 = vmatpush3.bf16.msra.mxu0 %v2818_v30 }
  0xb0   : > { %2580 = vmatprep.subr.bf16.mxu0 %v2820_v34 }
  0xb1   : > { %2603 = vmatpush3.bf16.msra.mxu1 %v2819_v37 }
  0xb2   : > { %2604 = vmatprep.subr.bf16.mxu1 %v2821_v9 }
  0xb3   : > { %2581 = vmatpush3.bf16.msra.mxu0 %v2820_v34 }
  0xb4   : > { %2582 = vmatprep.subr.bf16.mxu0 %v2822_v38 }
  0xb5   : > { %2605 = vmatpush3.bf16.msra.mxu1 %v2821_v9 }
  0xb6   : > { %2606 = vmatprep.subr.bf16.mxu1 %v2823_v42 }
  0xb7   : > { %2583 = vmatpush3.bf16.msra.mxu0 %v2822_v38 }
  0xb8   : > { %2584 = vmatprep.subr.bf16.mxu0 %v2824_v39 }
  0xb9   : > { %2607 = vmatpush3.bf16.msra.mxu1 %v2823_v42 }
  0xba   : > { %2608 = vmatprep.subr.bf16.mxu1 %v2825_v44 }
  0xbb   : > { %2585 = vmatpush3.bf16.msra.mxu0 %v2824_v39 }
  0xbc   : > { %2586 = vmatprep.subr.bf16.mxu0 %v2826_v43 }
  0xbd   : > { %2609 = vmatpush3.bf16.msra.mxu1 %v2825_v44 }
  0xbe   : > { %2610 = vmatprep.subr.bf16.mxu1 %v2827_v46 }
  0xbf   : > { %2587 = vmatpush3.bf16.msra.mxu0 %v2826_v43 }
  0xc0   : > { %2620 = vmatprep.subr.bf16.mxu0 %v2832_v45 }
  0xc1   : > { %2611 = vmatpush3.bf16.msra.mxu1 %v2827_v46 }
  0xc2   : > { %2589 = vmatmul.mubr.bf16.vlgmr.msra.gmra.mxu0 %v2830_v47  ;;  %2644 = vmatprep.subr.bf16.mxu1 %v2832_v45 }
  0xc3   : > { %2621 = vmatpush3.bf16.msra.mxu0 %v2832_v45  ;;  %2592 = vmatprep.mubr.bf16.mxu0 %v2834_v48 }
  0xc4   : > { %2622 = vmatprep.subr.bf16.mxu0 %v2833_v59  ;;  %2613 = vmatmul.mubr.bf16.vlgmr.msra.gmra.mxu1 %v2831_v49 }
  0xc5   : > { %2652 = vmatpush3.bf16.msra.mxu1 %v2832_v45  ;;  %2616 = vmatprep.mubr.bf16.mxu1 %v2837_v51 }
  0xc6   : > { %2645 = vmatprep.subr.bf16.mxu1 %v2833_v59 }
  0xc7   : > { %2623 = vmatpush3.bf16.msra.mxu0 %v2833_v59 }
  0xc8   : > { %2624 = vmatprep.subr.bf16.mxu0 %v2836_v50 }
  0xc9   : > { %2653 = vmatpush3.bf16.msra.mxu1 %v2833_v59 }
  0xca   : > { %2593 = vmatmul.mubr.bf16.gmra.mxu0 %v2835_v52  ;;  %2646 = vmatprep.subr.bf16.mxu1 %v2836_v50 }
  0xcb   : > { %2625 = vmatpush3.bf16.msra.mxu0 %v2836_v50  ;;  %2636 = vmatprep.mubr.bf16.mxu0 %v2844_v53 }
  0xcc   : > { %2626 = vmatprep.subr.bf16.mxu0 %v2839_v54  ;;  %2617 = vmatmul.mubr.bf16.gmra.mxu1 %v2838_v55 }
  0xcd   : > { %2654 = vmatpush3.bf16.msra.mxu1 %v2836_v50  ;;  %2640 = vmatprep.mubr.bf16.mxu1 %v2845_v57 }
  0xce   : > { %2647 = vmatprep.subr.bf16.mxu1 %v2839_v54 }
  0xcf   : > { %2627 = vmatpush3.bf16.msra.mxu0 %v2839_v54 }
  0xd0   : > { %2628 = vmatprep.subr.bf16.mxu0 %v2840_v56 }
  0xd1   : > { %2655 = vmatpush3.bf16.msra.mxu1 %v2839_v54 }
  0xd2   : > { %2648 = vmatprep.subr.bf16.mxu1 %v2840_v56 }
  0xd3   : > { %2629 = vmatpush3.bf16.msra.mxu0 %v2840_v56 }
  0xd4   : > { %2630 = vmatprep.subr.bf16.mxu0 %v2841_v58 }
  0xd5   : > { %2656 = vmatpush3.bf16.msra.mxu1 %v2840_v56 }
  0xd6   : > { %2649 = vmatprep.subr.bf16.mxu1 %v2841_v58 }
  0xd7   : > { %2631 = vmatpush3.bf16.msra.mxu0 %v2841_v58 }
  0xd8   : > { %2632 = vmatprep.subr.bf16.mxu0 %v2842_v60 }
  0xd9   : > { %2657 = vmatpush3.bf16.msra.mxu1 %v2841_v58 }
  0xda   : > { %2650 = vmatprep.subr.bf16.mxu1 %v2842_v60 }
  0xdb   : > { %2633 = vmatpush3.bf16.msra.mxu0 %v2842_v60 }
  0xdc   : > { %2634 = vmatprep.subr.bf16.mxu0 %v2843_v61 }
  0xdd   : > { %2658 = vmatpush3.bf16.msra.mxu1 %v2842_v60 }
  0xde   : > { %2651 = vmatprep.subr.bf16.mxu1 %v2843_v61 }
  0xdf   : > { %2635 = vmatpush3.bf16.msra.mxu0 %v2843_v61 }
  0xe1   : > { %2659 = vmatpush3.bf16.msra.mxu1 %v2843_v61 }
  0xe2   : > { %2637 = vmatmul.mubr.bf16.vlgmr.msra.gmra.mxu0 %v2846_v62 }
  0xe4   : > { %2641 = vmatmul.mubr.bf16.vlgmr.msra.gmra.mxu1 %v2847_v63 }
 0x122   : > { %v2446_v0 = vpop.f32.mrf.mxu0 }
 0x123   : > { %v2470_v3 = vpop.f32.mrf.mxu1 }
 0x124   : > { %v550_v1 = vpop.f32.mrf.mxu0  ;;  %v696_v51 = vadd.f32 %v2470_v3, %v2446_v0 }
 0x125   : > { %v687_v6 = vpop.f32.mrf.mxu1 }
 0x126   : > { %v2447_v2 = vpop.f32.mrf.mxu0  ;;  %v688_v55 = vadd.f32 %v687_v6, %v550_v1 }
 0x127   : > { %v2471_v8 = vpop.f32.mrf.mxu1 }
 0x128   : > { %v553_v4 = vpop.f32.mrf.mxu0  ;;  %v699_v56 = vadd.f32 %v2471_v8, %v2447_v2 }
 0x129   : > { %v690_v11 = vpop.f32.mrf.mxu1 }
 0x12a   : > { %v2450_v5 = vpop.f32.mrf.mxu0  ;;  %v691_v61 = vadd.f32 %v690_v11, %v553_v4 }
 0x12c   : > { %v566_v7 = vpop.f32.mrf.mxu0 }
 0x12d   : > { %v2474_v12 = vpop.f32.mrf.mxu1 }
 0x12e   : > { %v2451_v10 = vpop.f32.mrf.mxu0  ;;  %v712_v62 = vadd.f32 %v2474_v12, %v2450_v5 }
 0x12f   : > { %v703_v15 = vpop.f32.mrf.mxu1 }
 0x130   : > { %v3205_v13 = vpop.f32.mrf.mxu0 }
 0x131   : > { %3288 = vst [vmem:[#allocation14_spill] sm:$0xff] %v3205_v13  ;;  %v2475_v17 = vpop.f32.mrf.mxu1 }
 0x133   : > { %v706_v19 = vpop.f32.mrf.mxu1 }
 0x142   : > { %v2494_v14 = vpop.f32.mrf.mxu0 }
 0x143   : > { %v882_v54 = vadd.f32 %v2494_v14, %v696_v51  ;;  %v715_v51 = vadd.f32 %v2475_v17, %v2451_v10 }
 0x144   : > { %v849_v16 = vpop.f32.mrf.mxu0  ;;  %v2518_v20 = vpop.f32.mrf.mxu1 }
 0x145   : > { %v880_v57 = vadd.f32 %v849_v16, %v688_v55  ;;  %v1053_v63 = vadd.f32 %v2518_v20, %v882_v54  ;;  %v3290_v55 = vld [vmem:[#allocation14_spill] sm:$0xff] }
 0x146   : > { %v2495_v18 = vpop.f32.mrf.mxu0  ;;  %v1020_v22 = vpop.f32.mrf.mxu1  ;;  %v707_v4 = vadd.f32 %v706_v19, %v3290_v55 }
 0x147   : > { %v883_v13 = vadd.f32 %v2495_v18, %v699_v56  ;;  %v1051_v1 = vadd.f32 %v1020_v22, %v880_v57 }
 0x148   : > { %v852_v21 = vpop.f32.mrf.mxu0  ;;  %v2519_v24 = vpop.f32.mrf.mxu1 }
 0x149   : > { %v881_v0 = vadd.f32 %v852_v21, %v691_v61  ;;  %v1054_v8 = vadd.f32 %v2519_v24, %v883_v13 }
 0x14a   : > { %v2498_v23 = vpop.f32.mrf.mxu0  ;;  %v1023_v26 = vpop.f32.mrf.mxu1 }
 0x14b   : > { %v886_v3 = vadd.f32 %v2498_v23, %v712_v62  ;;  %v1052_v20 = vadd.f32 %v1023_v26, %v881_v0 }
 0x14c   : > { %v865_v25 = vpop.f32.mrf.mxu0  ;;  %v2522_v28 = vpop.f32.mrf.mxu1 }
 0x14d   : > { %v1057_v54 = vadd.f32 %v2522_v28, %v886_v3 }
 0x14e   : > { %v2499_v27 = vpop.f32.mrf.mxu0  ;;  %v1036_v30 = vpop.f32.mrf.mxu1 }
 0x14f   : > { %v887_v11 = vadd.f32 %v2499_v27, %v715_v51 }
 0x150   : > { %v868_v29 = vpop.f32.mrf.mxu0  ;;  %v2523_v32 = vpop.f32.mrf.mxu1 }
 0x151   : > { %v1058_v17 = vadd.f32 %v2523_v32, %v887_v11 }
 0x152   : > { %v1039_v34 = vpop.f32.mrf.mxu1 }
 0x162   : > { %v2542_v31 = vpop.f32.mrf.mxu0 }
 0x163   : > { %v1224_v14 = vadd.f32 %v2542_v31, %v1053_v63 }
 0x164   : > { %v1191_v33 = vpop.f32.mrf.mxu0  ;;  %v2566_v36 = vpop.f32.mrf.mxu1 }
 0x165   : > { %v1222_v5 = vadd.f32 %v1191_v33, %v1051_v1  ;;  %v1395_v18 = vadd.f32 %v2566_v36, %v1224_v14 }
 0x166   : > { %v2543_v35 = vpop.f32.mrf.mxu0  ;;  %v1362_v38 = vpop.f32.mrf.mxu1 }
 0x167   : > { %v1225_v56 = vadd.f32 %v2543_v35, %v1054_v8  ;;  %v1393_v22 = vadd.f32 %v1362_v38, %v1222_v5 }
 0x168   : > { %v1194_v37 = vpop.f32.mrf.mxu0  ;;  %v2567_v39 = vpop.f32.mrf.mxu1 }
 0x169   : > { %v1223_v23 = vadd.f32 %v1194_v37, %v1052_v20  ;;  %v1396_v13 = vadd.f32 %v2567_v39, %v1225_v56 }
 0x16a   : > { %v2546_v9 = vpop.f32.mrf.mxu0  ;;  %v1365_v41 = vpop.f32.mrf.mxu1 }
 0x16b   : > { %v1228_v31 = vadd.f32 %v2546_v9, %v1057_v54 }
 0x16c   : > { %v1207_v40 = vpop.f32.mrf.mxu0  ;;  %v2570_v42 = vpop.f32.mrf.mxu1 }
 0x16d   : > { %v1399_v26 = vadd.f32 %v2570_v42, %v1228_v31 }
 0x16e   : > { %v2547_v43 = vpop.f32.mrf.mxu0  ;;  %v1378_v44 = vpop.f32.mrf.mxu1 }
 0x16f   : > { %v1229_v19 = vadd.f32 %v2547_v43, %v1058_v17 }
 0x170   : > { %v1210_v45 = vpop.f32.mrf.mxu0  ;;  %v2571_v47 = vpop.f32.mrf.mxu1 }
 0x171   : > { %v1400_v32 = vadd.f32 %v2571_v47, %v1229_v19 }
 0x172   : > { %v3207_v59 = vpop.f32.mrf.mxu1 }
 0x173   : > { %3289 = vst [vmem:[#allocation15_spill] sm:$0xff] %v3207_v59  ;;  %v704_v59 = vadd.f32 %v703_v15, %v566_v7  ;;  %v885_v7 = vadd.f32 %v868_v29, %v707_v4 }
 0x175   : > { %v884_v16 = vadd.f32 %v865_v25, %v704_v59  ;;  %v1056_v25 = vadd.f32 %v1039_v34, %v885_v7  ;;  %v1394_v59 = vadd.f32 %v1365_v41, %v1223_v23  ;;  %v2219_v34 = vld [vmem:[%s3271_s2] ss:$0 sm:$0xff] }
 0x177   : > { %v1055_v21 = vadd.f32 %v1036_v30, %v884_v16  ;;  %v1227_v35 = vadd.f32 %v1210_v45, %v1056_v25 }
 0x179   : > { %v1226_v24 = vadd.f32 %v1207_v40, %v1055_v21 }
 0x17a   : > { %v3291_v42 = vld [vmem:[#allocation15_spill] sm:$0xff] }
 0x17b   : > { %v1397_v30 = vadd.f32 %v1378_v44, %v1226_v24  ;;  %v1398_v43 = vadd.f32 %v3291_v42, %v1227_v35 }
 0x182   : > { %v2590_v46 = vpop.f32.mrf.mxu0 }
 0x183   : > { %v1566_v10 = vadd.f32 %v2590_v46, %v1395_v18 }
 0x184   : > { %v1533_v48 = vpop.f32.mrf.mxu0  ;;  %v2614_v49 = vpop.f32.mrf.mxu1 }
 0x185   : > { %v1564_v27 = vadd.f32 %v1533_v48, %v1393_v22  ;;  %v1737_v28 = vadd.f32 %v2614_v49, %v1566_v10 }
 0x186   : > { %v2591_v50 = vpop.f32.mrf.mxu0  ;;  %v1704_v52 = vpop.f32.mrf.mxu1 }
 0x187   : > { %v1567_v36 = vadd.f32 %v2591_v50, %v1396_v13  ;;  %v1735_v38 = vadd.f32 %v1704_v52, %v1564_v27 }
 0x188   : > { %v1536_v53 = vpop.f32.mrf.mxu0  ;;  %v2615_v58 = vpop.f32.mrf.mxu1 }
 0x189   : > { %v1565_v37 = vadd.f32 %v1536_v53, %v1394_v59  ;;  %v1738_v40 = vadd.f32 %v2615_v58, %v1567_v36 }
 0x18a   : > { %v2594_v60 = vpop.f32.mrf.mxu0  ;;  %v1707_v6 = vpop.f32.mrf.mxu1 }
 0x18b   : > { %v1570_v9 = vadd.f32 %v2594_v60, %v1399_v26  ;;  %v1736_v44 = vadd.f32 %v1707_v6, %v1565_v37 }
 0x18c   : > { %v1549_v2 = vpop.f32.mrf.mxu0  ;;  %v2618_v12 = vpop.f32.mrf.mxu1 }
 0x18d   : > { %v1568_v41 = vadd.f32 %v1549_v2, %v1397_v30  ;;  %v1741_v53 = vadd.f32 %v2618_v12, %v1570_v9 }
 0x18e   : > { %v2595_v15 = vpop.f32.mrf.mxu0  ;;  %v1720_v57 = vpop.f32.mrf.mxu1 }
 0x18f   : > { %v1571_v48 = vadd.f32 %v2595_v15, %v1400_v32  ;;  %v1739_v0 = vadd.f32 %v1720_v57, %v1568_v41 }
 0x190   : > { %v1552_v33 = vpop.f32.mrf.mxu0  ;;  %v2619_v29 = vpop.f32.mrf.mxu1 }
 0x191   : > { %v1569_v47 = vadd.f32 %v1552_v33, %v1398_v43  ;;  %v1742_v51 = vadd.f32 %v2619_v29, %v1571_v48 }
 0x192   : > { %v1723_v45 = vpop.f32.mrf.mxu1 }
 0x193   : > { %v1740_v6 = vadd.f32 %v1723_v45, %v1569_v47 }
 0x1a2   : > { %v2638_v61 = vpop.f32.mrf.mxu0 }
 0x1a3   : > { %v1908_v46 = vadd.f32 %v2638_v61, %v1737_v28 }
 0x1a4   : > { %v1875_v39 = vpop.f32.mrf.mxu0  ;;  %v2642_v52 = vpop.f32.mrf.mxu1 }
 0x1a5   : > { %v1906_v49 = vadd.f32 %v1875_v39, %v1735_v38  ;;  %v1922_v60 = vadd.f32 %v2219_v34, %v1908_v46  ;;  %v1912_v3 = vadd.f32 %v2642_v52, %v1741_v53 }
 0x1a6   : > { %v2639_v50 = vpop.f32.mrf.mxu0  ;;  %v1891_v2 = vpop.f32.mrf.mxu1 }
 0x1a7   : > { %v1909_v62 = vadd.f32 %v2639_v50, %v1738_v40  ;;  %v1920_v1 = vadd.f32 %v2219_v34, %v1906_v49  ;;  %v1930_v8 = vmax.f32 %v1922_v60, 0.0  ;;  %v1910_v16 = vadd.f32 %v1891_v2, %v1739_v0 }
 0x1a8   : > { %v1878_v63 = vpop.f32.mrf.mxu0  ;;  %v2643_v11 = vpop.f32.mrf.mxu1  ;;  %v1926_v5 = vadd.f32 %v2219_v34, %v1912_v3 }
 0x1a9   : > { %v1923_v14 = vadd.f32 %v2219_v34, %v1909_v62  ;;  %v1907_v58 = vadd.f32 %v1878_v63, %v1736_v44  ;;  %v1913_v20 = vadd.f32 %v2643_v11, %v1742_v51  ;;  %v1928_v54 = vmax.f32 %v1920_v1, 0.0 }
 0x1aa   : > { %v1894_v56 = vpop.f32.mrf.mxu1  ;;  %v1924_v7 = vadd.f32 %v2219_v34, %v1910_v16  ;;  %v1934_v31 = vmax.f32 %v1926_v5, 0.0 }
 0x1ab   : > { %v1931_v55 = vmax.f32 %v1923_v14, 0.0  ;;  %v1921_v4 = vadd.f32 %v2219_v34, %v1907_v58  ;;  %v1927_v15 = vadd.f32 %v2219_v34, %v1913_v20  ;;  %v1911_v21 = vadd.f32 %v1894_v56, %v1740_v6 }
 0x1ac   : > { %v1932_v22 = vmax.f32 %v1924_v7, 0.0 }
 0x1ad   : > { %v2296_v12 = vpack.c.bf16 %v1931_v55, %v1930_v8  ;;  %v1929_v18 = vmax.f32 %v1921_v4, 0.0  ;;  %v1935_v10 = vmax.f32 %v1927_v15, 0.0  ;;  %v1925_v17 = vadd.f32 %v2219_v34, %v1911_v21 }
 0x1af   : > { %2317 = vst [vmem:[%s235_s29 + $0x8] sm:$0xff] %v2296_v12   ;;  %v2291_v23 = vpack.c.bf16 %v1929_v18, %v1928_v54  ;;  %v2306_v57 = vpack.c.bf16 %v1935_v10, %v1934_v31  ;;  %v1933_v13 = vmax.f32 %v1925_v17, 0.0 }
 0x1b1   : > { %2292 = vst [vmem:[%s235_s29] sm:$0xff] %v2291_v23   ;;  %2319 = vst [vmem:[%s235_s29 + $0x18] sm:$0xff] %v2306_v57   ;;  %v2301_v24 = vpack.c.bf16 %v1933_v13, %v1932_v22 }
 0x1b3   : > { %2318 = vst [vmem:[%s235_s29 + $0x10] sm:$0xff] %v2301_v24  }
 0x1b4   : > { %2915 = shalt.err (!%p2912_p5)
}
 0x1b5   : > { %s2916_s26 = scalar_lea.hbm %s3221_s7, 512  ;;  %s2920_s20 = scalar_lea.hbm %s3272_s3, 1024 }
 0x1b6   : > { %p2917_p7 = scmp.ne.s32.totalorder %s3221_s7, %s2916_s26  ;;  %p2921_p9 = scmp.lt.s32.totalorder %s3221_s7, %s3272_s3 }
 0x1b7   : > { %p2922_p11 = scmp.lt.s32.totalorder %s2920_s20, %s2916_s26 }
 0x1b8   : > { %p2918_p6 = pnand %p2917_p7, %p3105_p13 }
 0x1b9   : > { %p2923_p12 = por %p2922_p11, %p2921_p9 }
 0x1ba   : > { %p2919_p4 = pneg %p2918_p6 }
 0x1bc   : > { %p2924_p1 = pnand %p2923_p12, %p2919_p4 }
 0x1be   : > { %2927 = shalt.err (!%p2924_p1)
}
 0x1bf   : > { %s2996_s29 = smov 64   ;;  %s2997_s21 = smov 4  }
 0x1c0   : > { %2666 = dma.vmem_to_hbm [thread:$0]  (%p3105_p13), %s3216_s4, 512, %s3221_s7, %s1977_s10, %s2996_s29, %s2996_s29, %s2997_s21  }
 0x1c1 PF: > { %s2006_s5 = sand.u32 1, %s2966_s12   ;;  %p3292_p8 = scmp.ne.s32.totalorder %s3277_s23, 0 }
 0x1c2   : > { %p3293_p10 = scmp.ge.s32.totalorder %s2986_s17, 2  ;;  %s2007_s6 = scalar_lea.sflag [#allocation7], %s2006_s5 }
 0x1c4   : > { %p2677_p0 = pnand %p3293_p10, %p3292_p8 }
 0x1c6   : > { %p2678_p2 = pneg %p2677_p0 }
 0x1c8   : > { %2961 = dma.done.wait (%p2678_p2), %s2007_s6, 512  }
 0x1c9   : > { %2963 = vsyncadd (%p2678_p2), %s2007_s6, 4294966784  ;;  %s20_s17 = sadd.s32 1, %s2986_s17   ;;  %s3294_s12 = smov %s2970_s13 }
 0x1ca   : > { %p17_p3 = scmp.ge.s32.totalorder %s20_s17, 4   ;;  %s3295_s13 = smov %s2974_s14 }
 0x1cb   : > { %s3296_s14 = smov %s3114_s19  ;;  %s3297_s15 = smov %s2982_s16 }
 0x1cc   : > { %s3298_s16 = smov %s3300_s28  ;;  %19 = sbr.rel (!%p17_p3) target bundleno = 7 (0x7), region = 109 }
 0x1d1   :  { %2012 = vsyncpa [#allocation6], 1 }
 0x1d2   :  { %2014 = vsyncpa [#allocation6 + $0x1], 1 }
 0x1d3   :  { %2015 = vsyncpa [#allocation9], 1 }
 0x1d4   :  { %2016 = vsyncpa [#allocation7], 1 }
 0x1d5   :  { %2018 = vsyncpa [#allocation7 + $0x1], 1 }

</bundles_post_ra>
